<compile_context>
chip_gen: v6e
topology: v6e:2x2x1
jax: 0.10.0
libtpu: 0.0.40
codegen_flags: <defaults>
</compile_context>

<pallas_src>
import functools
import math

import jax
import jax.numpy as jnp
from jax import lax
from jax.experimental import pallas as pl
from jax.experimental.pallas import tpu as pltpu

NUM_HEADS = 8
LN_EPS = 1e-5
_GELU_C = 0.7978845608028654  # sqrt(2/pi)


def _ln(v, w, b):
    mu = jnp.mean(v, axis=-1, keepdims=True)
    c = v - mu
    var = jnp.mean(c * c, axis=-1, keepdims=True)
    return c * lax.rsqrt(var + LN_EPS) * w + b


def _gelu(v):
    return 0.5 * v * (1.0 + jnp.tanh(_GELU_C * (v + 0.044715 * v * v * v)))


def _entity_kernel(x_ref, w_h2_ref, w_rb1_ref, w_qkv_ref, w_d_ref, vec_ref,
                   out_ref, *, seq_len):
    N, D = x_ref.shape                       # N = rows in this grid step (= B_blk * S)
    H2 = w_h2_ref.shape[1]                   # 2*D
    H4 = w_rb1_ref.shape[1]                  # 4*D
    S = seq_len
    Bb = N // S
    BH = Bb * NUM_HEADS
    mxu = w_rb1_ref.dtype                    # MXU operand dtype (bf16 by default)

    V = vec_ref[...]                         # (NUM_HEADS + 14, 3*H2) f32: head mask + biases/LN
    hmask = V[0:NUM_HEADS, :H2]              # (NH, H2): 1.0 on head h's lanes, else 0.0
    vb = NUM_HEADS                           # first bias/LayerNorm row

    def dot(a, w):                           # bf16 operands, f32 accumulation on the MXU
        return jnp.dot(a.astype(mxu), w, preferred_element_type=jnp.float32)

    x2 = x_ref[...]                          # one contiguous (N, D) slab load

    # entity_processor[0]: Linear D -> 2D
    h = dot(x2, w_h2_ref[0:D, :]) + V[vb + 0, :H2]

    # ResidualBlock(2D): Linear 2D->4D, LayerNorm, GELU, (Dropout), Linear 4D->2D, residual
    z = dot(h, w_rb1_ref[...]) + V[vb + 1, :H4]
    z = _gelu(_ln(z, V[vb + 2, :H4], V[vb + 3, :H4]))
    z = dot(z, w_h2_ref[D:D + H4, :]) + V[vb + 4, :H2]
    h = h + z

    # SelfAttentionBlock(2D): packed QKV projection (Q pre-scaled by 1/sqrt(head_dim)).
    qkv = dot(h, w_qkv_ref[...]) + V[vb + 5, :]
    q = qkv[:, 0:H2].reshape(Bb, S, H2)
    k = qkv[:, H2:2 * H2].reshape(Bb, S, H2)
    v = qkv[:, 2 * H2:3 * H2].reshape(Bb, S, H2)

    # Head-masked batched attention: masking K zeroes cross-head score terms, masking V makes
    # the head merge a plain sum over heads.  No per-head lane slicing / stacking / concats.
    def per_head(m):                         # (Bb, S, H2) -> (Bb*NH, S, H2), replicated
        return jnp.broadcast_to(m[:, None, :, :],
                                (Bb, NUM_HEADS, S, H2)).reshape(BH, S, H2)

    qb = per_head(q)
    km = (k[:, None, :, :] * hmask[None, :, None, :]).reshape(BH, S, H2)
    vm = (v[:, None, :, :] * hmask[None, :, None, :]).reshape(BH, S, H2)

    s = jnp.einsum('bqd,bkd->bqk', qb.astype(mxu), km.astype(mxu),
                   preferred_element_type=jnp.float32)               # (BH, S, S)
    s = s - jnp.max(s, axis=-1, keepdims=True)
    p = jnp.exp(s)
    p = p * pl.reciprocal(jnp.sum(p, axis=-1, keepdims=True), approx=True)
    o = jnp.einsum('bqk,bkd->bqd', p.astype(mxu), vm.astype(mxu),
                   preferred_element_type=jnp.float32)               # (BH, S, H2)
    attn = jnp.sum(o.reshape(Bb, NUM_HEADS, S, H2), axis=1).reshape(N, H2)

    attn = dot(attn, w_h2_ref[D + H4:D + H4 + H2, :]) + V[vb + 6, :H2]
    h = _ln(h + attn, V[vb + 7, :H2], V[vb + 8, :H2])   # norm(residual + attn)

    # entity_processor[3]: Linear 2D -> D  (entity_features)
    ef = dot(h, w_d_ref[0:H2, :]) + V[vb + 9, :D]

    # confidence_scorer: Linear D->2D, LayerNorm, GELU, Linear 2D->D, sigmoid gate
    c = dot(ef, w_h2_ref[D + H4 + H2:, :]) + V[vb + 10, :H2]
    c = _gelu(_ln(c, V[vb + 11, :H2], V[vb + 12, :H2]))
    c = dot(c, w_d_ref[H2:, :]) + V[vb + 13, :D]

    out_ref[...] = ef * jax.nn.sigmoid(c)    # one lane-dense (N, D) store


def _pick_batch_block(B, S, max_rows=1024):
    """Batches per grid step.  Per-step fixed cost (~0.35us) dwarfs compute at small row
    counts, so use a single grid step unless B*S is large; when splitting, keep each step at
    several hundred stacked rows (never split inside a sequence)."""
    divisors = [d for d in range(1, B + 1) if B % d == 0]
    fits = [d for d in divisors if d * S <= max_rows]
    return max(fits) if fits else 1


def prepare_params(p, num_heads=NUM_HEADS, mxu_dtype=jnp.bfloat16):
    """Raw (PyTorch-layout) params -> kernel layout: pre-transposed weights packed into 4
    row-stacked slabs (stored in the MXU operand dtype), Q scaled by 1/sqrt(head_dim), and the
    head mask + all 14 bias/LayerNorm vectors packed into ONE f32 slab."""
    H2, D = p['ep1_w'].shape
    H4 = p['rb1_w'].shape[0]
    HD = H2 // num_heads
    W3 = 3 * H2
    scale = 1.0 / math.sqrt(HD)

    w_qkv = jnp.transpose(p['in_proj_w'])                  # (H2, 3*H2)
    b_qkv = p['in_proj_b']
    w_qkv = w_qkv.at[:, :H2].multiply(scale)               # fold softmax scale into Q
    b_qkv = b_qkv.at[:H2].multiply(scale)

    # Weight slabs grouped by output width; row-stacked so in-kernel slicing is along the
    # cheap, 8-aligned sublane axis.
    w_h2 = jnp.concatenate([jnp.transpose(p['ep1_w']),     # rows [0 : D)
                            jnp.transpose(p['rb2_w']),     # rows [D : D+H4)
                            jnp.transpose(p['out_w']),     # rows [D+H4 : D+H4+H2)
                            jnp.transpose(p['cs1_w'])],    # rows [D+H4+H2 : D+H4+H2+D)
                           axis=0).astype(mxu_dtype)
    w_rb1 = jnp.transpose(p['rb1_w']).astype(mxu_dtype)    # (H2, H4)
    w_qkv = w_qkv.astype(mxu_dtype)                        # (H2, 3*H2)
    w_d = jnp.concatenate([jnp.transpose(p['ep2_w']),      # rows [0 : H2)
                           jnp.transpose(p['cs2_w'])],     # rows [H2 : 2*H2)
                          axis=0).astype(mxu_dtype)

    # Head mask (rows 0..NH-1) + 14 bias/LayerNorm vectors, zero-padded to width 3*H2.
    def row(vv):
        return jnp.pad(vv.astype(jnp.float32), (0, W3 - vv.shape[0]))[None, :]

    lane = jnp.arange(H2)[None, :]
    head = jnp.arange(num_heads)[:, None]
    hmask = ((lane // HD) == head).astype(jnp.float32)     # (NH, H2)
    hmask = jnp.pad(hmask, ((0, 0), (0, W3 - H2)))
    vecs = jnp.concatenate(
        [hmask,
         row(p['ep1_b']), row(p['rb1_b']), row(p['rb_ln_w']), row(p['rb_ln_b']),
         row(p['rb2_b']), row(b_qkv), row(p['out_b']), row(p['sa_ln_w']),
         row(p['sa_ln_b']), row(p['ep2_b']), row(p['cs1_b']), row(p['cs_ln_w']),
         row(p['cs_ln_b']), row(p['cs2_b'])], axis=0)      # (NH + 14, 3*H2)

    return {'w_h2': w_h2, 'w_rb1': w_rb1, 'w_qkv': w_qkv, 'w_d': w_d, 'vecs': vecs}


def entity_recognizer(x, params, mxu_dtype=jnp.bfloat16):
    """x: (B, S, D) or (B, D) float32.  Returns the same shape (float32)."""
    squeeze_seq = (x.ndim == 2)
    if squeeze_seq:
        x = x[:, None, :]
    B, S, D = x.shape
    kp = prepare_params(params, mxu_dtype=mxu_dtype)
    H2 = kp['w_h2'].shape[1]
    H4 = kp['w_rb1'].shape[1]
    assert H2 % NUM_HEADS == 0

    B_blk = _pick_batch_block(B, S)
    grid = (B // B_blk,)
    rows_blk = B_blk * S
    N = B * S

    x_flat = x.reshape(N, D)                 # lane-dense 2-D slab read/written directly

    def rep(a):                              # whole-array block, constant index
        nd = a.ndim
        return pl.BlockSpec(a.shape, lambda i, _nd=nd: (0,) * _nd)

    order = ['w_h2', 'w_rb1', 'w_qkv', 'w_d', 'vecs']
    in_specs = ([pl.BlockSpec((rows_blk, D), lambda i: (i, 0))]
                + [rep(kp[k]) for k in order])

    # Advisory cost estimate for XLA's scheduler.
    macs_per_row = (D * H2 + H2 * H4 + H4 * H2 + H2 * 3 * H2 + H2 * H2
                    + H2 * D + D * H2 + H2 * D)
    attn_macs_per_row = 2 * NUM_HEADS * S * H2          # scores + PV (masked full-H2 width)
    flops = 2 * N * (macs_per_row + attn_macs_per_row)
    transcendentals = N * (H4 + H2 + NUM_HEADS * S + D)  # GELU tanh + softmax exp + sigmoid
    bytes_accessed = (2 * 4 * N * D
                      + int(sum(v.size * v.dtype.itemsize for v in kp.values())))

    out = pl.pallas_call(
        functools.partial(_entity_kernel, seq_len=S),
        out_shape=jax.ShapeDtypeStruct((N, D), jnp.float32),
        grid=grid,
        in_specs=in_specs,
        out_specs=pl.BlockSpec((rows_blk, D), lambda i: (i, 0)),
        compiler_params=pltpu.CompilerParams(dimension_semantics=("parallel",)),
        cost_estimate=pl.CostEstimate(flops=flops, transcendentals=transcendentals,
                                      bytes_accessed=bytes_accessed),
    )(x_flat, *[kp[k] for k in order])

    out = out.reshape(B, S, D)
    return out[:, 0, :] if squeeze_seq else out


def init_params(key, D):
    """PyTorch-style init, PyTorch weight layout (out_features, in_features)."""
    H2, H4 = 2 * D, 4 * D

    def linear(k, fan_in, fan_out):
        kw, kb = jax.random.split(k)
        bound = 1.0 / math.sqrt(fan_in)
        w = jax.random.uniform(kw, (fan_out, fan_in), jnp.float32, -bound, bound)
        b = jax.random.uniform(kb, (fan_out,), jnp.float32, -bound, bound)
        return w, b

    ks = jax.random.split(key, 8)
    p = {}
    p['ep1_w'], p['ep1_b'] = linear(ks[0], D, H2)
    p['rb1_w'], p['rb1_b'] = linear(ks[1], H2, H4)
    p['rb_ln_w'], p['rb_ln_b'] = jnp.ones((H4,), jnp.float32), jnp.zeros((H4,), jnp.float32)
    p['rb2_w'], p['rb2_b'] = linear(ks[2], H4, H2)
    p['in_proj_w'], p['in_proj_b'] = linear(ks[3], H2, 3 * H2)
    p['out_w'], p['out_b'] = linear(ks[4], H2, H2)
    p['sa_ln_w'], p['sa_ln_b'] = jnp.ones((H2,), jnp.float32), jnp.zeros((H2,), jnp.float32)
    p['ep2_w'], p['ep2_b'] = linear(ks[5], H2, D)
    p['cs1_w'], p['cs1_b'] = linear(ks[6], D, H2)
    p['cs_ln_w'], p['cs_ln_b'] = jnp.ones((H2,), jnp.float32), jnp.zeros((H2,), jnp.float32)
    p['cs2_w'], p['cs2_b'] = linear(ks[7], H2, D)
    return p


def _reference(x, p, num_heads=NUM_HEADS):
    """Pure-JAX f32 mirror of the PyTorch forward (eval mode, tanh-GELU)."""
    def ln(v, w, b):
        mu = jnp.mean(v, -1, keepdims=True)
        var = jnp.mean((v - mu) ** 2, -1, keepdims=True)
        return (v - mu) / jnp.sqrt(var + LN_EPS) * w + b

    def gelu(v):
        return 0.5 * v * (1.0 + jnp.tanh(_GELU_C * (v + 0.044715 * v ** 3)))

    with jax.default_matmul_precision("highest"):
        h = x @ p['ep1_w'].T + p['ep1_b']
        z = h @ p['rb1_w'].T + p['rb1_b']
        z = gelu(ln(z, p['rb_ln_w'], p['rb_ln_b']))
        z = z @ p['rb2_w'].T + p['rb2_b']
        h = h + z

        B, S, H2 = h.shape
        HD = H2 // num_heads
        qkv = h @ p['in_proj_w'].T + p['in_proj_b']
        q, k, v = jnp.split(qkv, 3, axis=-1)
        q = q.reshape(B, S, num_heads, HD).transpose(0, 2, 1, 3)
        k = k.reshape(B, S, num_heads, HD).transpose(0, 2, 1, 3)
        v = v.reshape(B, S, num_heads, HD).transpose(0, 2, 1, 3)
        s = jnp.einsum('bhqd,bhkd->bhqk', q, k) / math.sqrt(HD)
        w_attn = jax.nn.softmax(s, axis=-1)
        a = jnp.einsum('bhqk,bhkd->bhqd', w_attn, v).transpose(0, 2, 1, 3).reshape(B, S, H2)
        a = a @ p['out_w'].T + p['out_b']
        h = ln(h + a, p['sa_ln_w'], p['sa_ln_b'])

        ef = h @ p['ep2_w'].T + p['ep2_b']
        c = ef @ p['cs1_w'].T + p['cs1_b']
        c = gelu(ln(c, p['cs_ln_w'], p['cs_ln_b']))
        c = c @ p['cs2_w'].T + p['cs2_b']
        return ef * jax.nn.sigmoid(c)


if __name__ == "__main__":
    B, S, D = 2, 8, 32    # embedding_dim=32 -> internal width 64, 8 heads -> head_dim 8
    key = jax.random.PRNGKey(0)
    kx, kparam = jax.random.split(key)
    x = jax.random.normal(kx, (B, S, D), jnp.float32)
    params = init_params(kparam, D)

    ref = _reference(x, params)

    # Algorithmic check: f32 MXU operands must match the exact-f32 reference tightly.
    out_f32 = jax.block_until_ready(entity_recognizer(x, params, mxu_dtype=jnp.float32))
    assert out_f32.shape == ref.shape == (B, S, D)
    err32 = jnp.max(jnp.abs(out_f32 - ref))
    assert jnp.allclose(out_f32, ref, atol=2e-3, rtol=2e-3), f"f32 max abs err {err32}"

    # Performance configuration (review feedback): bf16 MXU operands, f32 accumulation.
    # Tolerance sized for single-pass bf16 operand rounding (~0.4% relative per matmul,
    # compounded over 8 stacked matmuls) against the exact-f32 reference.
    out = jax.block_until_ready(entity_recognizer(x, params))
    assert out.shape == (B, S, D)
    errbf = jnp.max(jnp.abs(out - ref))
    assert jnp.allclose(out, ref, atol=4e-2, rtol=4e-2), f"bf16 max abs err {errbf}"

    print("KERNEL_OK")
</pallas_src>

<mosaic_0001>
module attributes {stable_mosaic.version = 11 : i64} {
  func.func @_entity_kernel(%arg0: i32, %arg1: memref<16x32xf32, #tpu.memory_space<vmem>>, %arg2: memref<256x64xf32, #tpu.memory_space<vmem>>, %arg3: memref<64x128xf32, #tpu.memory_space<vmem>>, %arg4: memref<64x192xf32, #tpu.memory_space<vmem>>, %arg5: memref<128x32xf32, #tpu.memory_space<vmem>>, %arg6: memref<22x192xf32, #tpu.memory_space<vmem>>, %arg7: memref<16x32xf32, #tpu.memory_space<vmem>>) attributes {dimension_semantics = [#tpu.dimension_semantics<parallel>], iteration_bounds = array<i64: 1>, scalar_prefetch = 0 : i64, scratch_operands = 0 : i64, tpu.core_type = #tpu.core_type<tc>, window_params = [{transform_indices = @transform_0, window_bounds = array<i64: 16, 32>}, {pipeline_mode = #tpu.pipeline_mode<synchronous>, transform_indices = @transform_1, window_bounds = array<i64: 256, 64>}, {pipeline_mode = #tpu.pipeline_mode<synchronous>, transform_indices = @transform_2, window_bounds = array<i64: 64, 128>}, {pipeline_mode = #tpu.pipeline_mode<synchronous>, transform_indices = @transform_3, window_bounds = array<i64: 64, 192>}, {pipeline_mode = #tpu.pipeline_mode<synchronous>, transform_indices = @transform_4, window_bounds = array<i64: 128, 32>}, {pipeline_mode = #tpu.pipeline_mode<synchronous>, transform_indices = @transform_5, window_bounds = array<i64: 22, 192>}, {transform_indices = @transform_6, window_bounds = array<i64: 16, 32>}]} {
    %c0 = arith.constant 0 : index
    %c0_0 = arith.constant 0 : index
    %0 = vector.load %arg6[%c0, %c0_0] : memref<22x192xf32, #tpu.memory_space<vmem>>, vector<22x192xf32>
    %1 = vector.extract_strided_slice %0 {offsets = [0, 0], sizes = [8, 64], strides = [1, 1]} : vector<22x192xf32> to vector<8x64xf32>
    %c0_1 = arith.constant 0 : index
    %c0_2 = arith.constant 0 : index
    %2 = vector.load %arg1[%c0_1, %c0_2] : memref<16x32xf32, #tpu.memory_space<vmem>>, vector<16x32xf32>
    %c0_3 = arith.constant 0 : index
    %c0_4 = arith.constant 0 : index
    %3 = vector.load %arg2[%c0_3, %c0_4] : memref<256x64xf32, #tpu.memory_space<vmem>>, vector<32x64xf32>
    %cst = arith.constant dense<0.000000e+00> : vector<16x64xf32>
    %4 = tpu.matmul %2, %3, %cst {dimension_numbers = #tpu.dot_dimension_numbers<[1], [0], [0], [1], [0, 0, 1, 1], [], []>} : vector<16x32xf32>, vector<32x64xf32>, vector<16x64xf32> -> vector<16x64xf32>
    %5 = vector.extract_strided_slice %0 {offsets = [8, 0], sizes = [1, 64], strides = [1, 1]} : vector<22x192xf32> to vector<1x64xf32>
    %6 = vector.shape_cast %5 : vector<1x64xf32> to vector<64xf32>
    %7 = vector.shape_cast %6 : vector<64xf32> to vector<1x64xf32>
    %8 = vector.broadcast %7 : vector<1x64xf32> to vector<16x64xf32>
    %9 = arith.addf %4, %8 : vector<16x64xf32>
    %c0_5 = arith.constant 0 : index
    %c0_6 = arith.constant 0 : index
    %10 = vector.load %arg3[%c0_5, %c0_6] : memref<64x128xf32, #tpu.memory_space<vmem>>, vector<64x128xf32>
    %cst_7 = arith.constant dense<0.000000e+00> : vector<16x128xf32>
    %11 = tpu.matmul %9, %10, %cst_7 {dimension_numbers = #tpu.dot_dimension_numbers<[1], [0], [0], [1], [0, 0, 1, 1], [], []>} : vector<16x64xf32>, vector<64x128xf32>, vector<16x128xf32> -> vector<16x128xf32>
    %12 = vector.extract_strided_slice %0 {offsets = [9, 0], sizes = [1, 128], strides = [1, 1]} : vector<22x192xf32> to vector<1x128xf32>
    %13 = vector.shape_cast %12 : vector<1x128xf32> to vector<128xf32>
    %14 = vector.shape_cast %13 : vector<128xf32> to vector<1x128xf32>
    %15 = vector.broadcast %14 : vector<1x128xf32> to vector<16x128xf32>
    %16 = arith.addf %11, %15 : vector<16x128xf32>
    %17 = vector.extract_strided_slice %0 {offsets = [10, 0], sizes = [1, 128], strides = [1, 1]} : vector<22x192xf32> to vector<1x128xf32>
    %18 = vector.shape_cast %17 : vector<1x128xf32> to vector<128xf32>
    %19 = vector.extract_strided_slice %0 {offsets = [11, 0], sizes = [1, 128], strides = [1, 1]} : vector<22x192xf32> to vector<1x128xf32>
    %20 = vector.shape_cast %19 : vector<1x128xf32> to vector<128xf32>
    %cst_8 = arith.constant dense<0.000000e+00> : vector<16xf32>
    %21 = vector.multi_reduction <add>, %16, %cst_8 [1] : vector<16x128xf32> to vector<16xf32>
    %22 = vector.shape_cast %21 : vector<16xf32> to vector<16x1xf32>
    %cst_9 = arith.constant 1.280000e+02 : f32
    %23 = vector.broadcast %cst_9 : f32 to vector<16x1xf32>
    %24 = arith.divf %22, %23 : vector<16x1xf32>
    %25 = vector.broadcast %24 : vector<16x1xf32> to vector<16x128xf32>
    %26 = arith.subf %16, %25 : vector<16x128xf32>
    %27 = arith.mulf %26, %26 : vector<16x128xf32>
    %cst_10 = arith.constant dense<0.000000e+00> : vector<16xf32>
    %28 = vector.multi_reduction <add>, %27, %cst_10 [1] : vector<16x128xf32> to vector<16xf32>
    %29 = vector.shape_cast %28 : vector<16xf32> to vector<16x1xf32>
    %cst_11 = arith.constant 1.280000e+02 : f32
    %30 = vector.broadcast %cst_11 : f32 to vector<16x1xf32>
    %31 = arith.divf %29, %30 : vector<16x1xf32>
    %cst_12 = arith.constant 9.99999974E-6 : f32
    %32 = vector.broadcast %cst_12 : f32 to vector<16x1xf32>
    %33 = arith.addf %31, %32 : vector<16x1xf32>
    %34 = math.rsqrt %33 : vector<16x1xf32>
    %35 = vector.broadcast %34 : vector<16x1xf32> to vector<16x128xf32>
    %36 = arith.mulf %26, %35 : vector<16x128xf32>
    %37 = vector.shape_cast %18 : vector<128xf32> to vector<1x128xf32>
    %38 = vector.broadcast %37 : vector<1x128xf32> to vector<16x128xf32>
    %39 = arith.mulf %36, %38 : vector<16x128xf32>
    %40 = vector.shape_cast %20 : vector<128xf32> to vector<1x128xf32>
    %41 = vector.broadcast %40 : vector<1x128xf32> to vector<16x128xf32>
    %42 = arith.addf %39, %41 : vector<16x128xf32>
    %cst_13 = arith.constant 5.000000e-01 : f32
    %43 = vector.broadcast %cst_13 : f32 to vector<16x128xf32>
    %44 = arith.mulf %43, %42 : vector<16x128xf32>
    %cst_14 = arith.constant 4.471500e-02 : f32
    %45 = vector.broadcast %cst_14 : f32 to vector<16x128xf32>
    %46 = arith.mulf %45, %42 : vector<16x128xf32>
    %47 = arith.mulf %46, %42 : vector<16x128xf32>
    %48 = arith.mulf %47, %42 : vector<16x128xf32>
    %49 = arith.addf %42, %48 : vector<16x128xf32>
    %cst_15 = arith.constant 0.797884583 : f32
    %50 = vector.broadcast %cst_15 : f32 to vector<16x128xf32>
    %51 = arith.mulf %50, %49 : vector<16x128xf32>
    %52 = math.tanh %51 : vector<16x128xf32>
    %cst_16 = arith.constant 1.000000e+00 : f32
    %53 = vector.broadcast %cst_16 : f32 to vector<16x128xf32>
    %54 = arith.addf %53, %52 : vector<16x128xf32>
    %55 = arith.mulf %44, %54 : vector<16x128xf32>
    %c32 = arith.constant 32 : index
    %c0_17 = arith.constant 0 : index
    %56 = vector.load %arg2[%c32, %c0_17] : memref<256x64xf32, #tpu.memory_space<vmem>>, vector<128x64xf32>
    %cst_18 = arith.constant dense<0.000000e+00> : vector<16x64xf32>
    %57 = tpu.matmul %55, %56, %cst_18 {dimension_numbers = #tpu.dot_dimension_numbers<[1], [0], [0], [1], [0, 0, 1, 1], [], []>} : vector<16x128xf32>, vector<128x64xf32>, vector<16x64xf32> -> vector<16x64xf32>
    %58 = vector.extract_strided_slice %0 {offsets = [12, 0], sizes = [1, 64], strides = [1, 1]} : vector<22x192xf32> to vector<1x64xf32>
    %59 = vector.shape_cast %58 : vector<1x64xf32> to vector<64xf32>
    %60 = vector.shape_cast %59 : vector<64xf32> to vector<1x64xf32>
    %61 = vector.broadcast %60 : vector<1x64xf32> to vector<16x64xf32>
    %62 = arith.addf %57, %61 : vector<16x64xf32>
    %63 = arith.addf %9, %62 : vector<16x64xf32>
    %c0_19 = arith.constant 0 : index
    %c0_20 = arith.constant 0 : index
    %64 = vector.load %arg4[%c0_19, %c0_20] : memref<64x192xf32, #tpu.memory_space<vmem>>, vector<64x192xf32>
    %cst_21 = arith.constant dense<0.000000e+00> : vector<16x192xf32>
    %65 = tpu.matmul %63, %64, %cst_21 {dimension_numbers = #tpu.dot_dimension_numbers<[1], [0], [0], [1], [0, 0, 1, 1], [], []>} : vector<16x64xf32>, vector<64x192xf32>, vector<16x192xf32> -> vector<16x192xf32>
    %66 = vector.extract_strided_slice %0 {offsets = [13, 0], sizes = [1, 192], strides = [1, 1]} : vector<22x192xf32> to vector<1x192xf32>
    %67 = vector.shape_cast %66 : vector<1x192xf32> to vector<192xf32>
    %68 = vector.shape_cast %67 : vector<192xf32> to vector<1x192xf32>
    %69 = vector.broadcast %68 : vector<1x192xf32> to vector<16x192xf32>
    %70 = arith.addf %65, %69 : vector<16x192xf32>
    %71 = vector.extract_strided_slice %70 {offsets = [0, 0], sizes = [16, 64], strides = [1, 1]} : vector<16x192xf32> to vector<16x64xf32>
    %72 = vector.shape_cast %71 : vector<16x64xf32> to vector<2x8x64xf32>
    %73 = vector.extract_strided_slice %70 {offsets = [0, 64], sizes = [16, 64], strides = [1, 1]} : vector<16x192xf32> to vector<16x64xf32>
    %74 = vector.shape_cast %73 : vector<16x64xf32> to vector<2x8x64xf32>
    %75 = vector.extract_strided_slice %70 {offsets = [0, 128], sizes = [16, 64], strides = [1, 1]} : vector<16x192xf32> to vector<16x64xf32>
    %76 = vector.shape_cast %75 : vector<16x64xf32> to vector<2x8x64xf32>
    %77 = vector.shape_cast %72 : vector<2x8x64xf32> to vector<2x1x8x64xf32>
    %78 = vector.shape_cast %77 : vector<2x1x8x64xf32> to vector<2x1x8x64xf32>
    %79 = vector.broadcast %78 : vector<2x1x8x64xf32> to vector<2x8x8x64xf32>
    %80 = vector.shape_cast %79 : vector<2x8x8x64xf32> to vector<16x8x64xf32>
    %81 = vector.shape_cast %74 : vector<2x8x64xf32> to vector<2x1x8x64xf32>
    %82 = vector.shape_cast %1 : vector<8x64xf32> to vector<1x8x1x64xf32>
    %83 = vector.broadcast %81 : vector<2x1x8x64xf32> to vector<2x8x8x64xf32>
    %84 = vector.broadcast %82 : vector<1x8x1x64xf32> to vector<2x8x8x64xf32>
    %85 = arith.mulf %83, %84 : vector<2x8x8x64xf32>
    %86 = vector.shape_cast %85 : vector<2x8x8x64xf32> to vector<16x8x64xf32>
    %87 = vector.shape_cast %76 : vector<2x8x64xf32> to vector<2x1x8x64xf32>
    %88 = vector.shape_cast %1 : vector<8x64xf32> to vector<1x8x1x64xf32>
    %89 = vector.broadcast %87 : vector<2x1x8x64xf32> to vector<2x8x8x64xf32>
    %90 = vector.broadcast %88 : vector<1x8x1x64xf32> to vector<2x8x8x64xf32>
    %91 = arith.mulf %89, %90 : vector<2x8x8x64xf32>
    %92 = vector.shape_cast %91 : vector<2x8x8x64xf32> to vector<16x8x64xf32>
    "tpu.trace_start"() <{level = 10 : i32, message = "bqd,bkd->bqk"}> : () -> ()
    %cst_22 = arith.constant dense<0.000000e+00> : vector<16x8x8xf32>
    %93 = tpu.matmul %80, %86, %cst_22 {dimension_numbers = #tpu.dot_dimension_numbers<[2], [2], [1], [1], [0, 0, 0, 1, 1, 1], [0], [0]>} : vector<16x8x64xf32>, vector<16x8x64xf32>, vector<16x8x8xf32> -> vector<16x8x8xf32>
    "tpu.trace_stop"() : () -> ()
    %cst_23 = arith.constant dense<0xFF800000> : vector<16x8xf32>
    %94 = vector.multi_reduction <maximumf>, %93, %cst_23 [2] : vector<16x8x8xf32> to vector<16x8xf32>
    %95 = vector.shape_cast %94 : vector<16x8xf32> to vector<16x8x1xf32>
    %96 = vector.broadcast %95 : vector<16x8x1xf32> to vector<16x8x8xf32>
    %97 = arith.subf %93, %96 : vector<16x8x8xf32>
    %98 = math.exp %97 : vector<16x8x8xf32>
    %cst_24 = arith.constant dense<0.000000e+00> : vector<16x8xf32>
    %99 = vector.multi_reduction <add>, %98, %cst_24 [2] : vector<16x8x8xf32> to vector<16x8xf32>
    %100 = vector.shape_cast %99 : vector<16x8xf32> to vector<16x8x1xf32>
    %101 = tpu.reciprocal %100 {approx = true} : vector<16x8x1xf32> -> vector<16x8x1xf32>
    %102 = vector.broadcast %101 : vector<16x8x1xf32> to vector<16x8x8xf32>
    %103 = arith.mulf %98, %102 : vector<16x8x8xf32>
    "tpu.trace_start"() <{level = 10 : i32, message = "bqk,bkd->bqd"}> : () -> ()
    %cst_25 = arith.constant dense<0.000000e+00> : vector<16x8x64xf32>
    %104 = tpu.matmul %103, %92, %cst_25 {dimension_numbers = #tpu.dot_dimension_numbers<[2], [1], [1], [2], [0, 0, 0, 1, 1, 2], [0], [0]>} : vector<16x8x8xf32>, vector<16x8x64xf32>, vector<16x8x64xf32> -> vector<16x8x64xf32>
    "tpu.trace_stop"() : () -> ()
    %105 = vector.shape_cast %104 : vector<16x8x64xf32> to vector<2x8x8x64xf32>
    %cst_26 = arith.constant dense<0.000000e+00> : vector<2x8x64xf32>
    %106 = vector.multi_reduction <add>, %105, %cst_26 [1] : vector<2x8x8x64xf32> to vector<2x8x64xf32>
    %107 = vector.shape_cast %106 : vector<2x8x64xf32> to vector<16x64xf32>
    %c160 = arith.constant 160 : index
    %c0_27 = arith.constant 0 : index
    %108 = vector.load %arg2[%c160, %c0_27] : memref<256x64xf32, #tpu.memory_space<vmem>>, vector<64x64xf32>
    %cst_28 = arith.constant dense<0.000000e+00> : vector<16x64xf32>
    %109 = tpu.matmul %107, %108, %cst_28 {dimension_numbers = #tpu.dot_dimension_numbers<[1], [0], [0], [1], [0, 0, 1, 1], [], []>} : vector<16x64xf32>, vector<64x64xf32>, vector<16x64xf32> -> vector<16x64xf32>
    %110 = vector.extract_strided_slice %0 {offsets = [14, 0], sizes = [1, 64], strides = [1, 1]} : vector<22x192xf32> to vector<1x64xf32>
    %111 = vector.shape_cast %110 : vector<1x64xf32> to vector<64xf32>
    %112 = vector.shape_cast %111 : vector<64xf32> to vector<1x64xf32>
    %113 = vector.broadcast %112 : vector<1x64xf32> to vector<16x64xf32>
    %114 = arith.addf %109, %113 : vector<16x64xf32>
    %115 = arith.addf %63, %114 : vector<16x64xf32>
    %116 = vector.extract_strided_slice %0 {offsets = [15, 0], sizes = [1, 64], strides = [1, 1]} : vector<22x192xf32> to vector<1x64xf32>
    %117 = vector.shape_cast %116 : vector<1x64xf32> to vector<64xf32>
    %118 = vector.extract_strided_slice %0 {offsets = [16, 0], sizes = [1, 64], strides = [1, 1]} : vector<22x192xf32> to vector<1x64xf32>
    %119 = vector.shape_cast %118 : vector<1x64xf32> to vector<64xf32>
    %cst_29 = arith.constant dense<0.000000e+00> : vector<16xf32>
    %120 = vector.multi_reduction <add>, %115, %cst_29 [1] : vector<16x64xf32> to vector<16xf32>
    %121 = vector.shape_cast %120 : vector<16xf32> to vector<16x1xf32>
    %cst_30 = arith.constant 6.400000e+01 : f32
    %122 = vector.broadcast %cst_30 : f32 to vector<16x1xf32>
    %123 = arith.divf %121, %122 : vector<16x1xf32>
    %124 = vector.broadcast %123 : vector<16x1xf32> to vector<16x64xf32>
    %125 = arith.subf %115, %124 : vector<16x64xf32>
    %126 = arith.mulf %125, %125 : vector<16x64xf32>
    %cst_31 = arith.constant dense<0.000000e+00> : vector<16xf32>
    %127 = vector.multi_reduction <add>, %126, %cst_31 [1] : vector<16x64xf32> to vector<16xf32>
    %128 = vector.shape_cast %127 : vector<16xf32> to vector<16x1xf32>
    %cst_32 = arith.constant 6.400000e+01 : f32
    %129 = vector.broadcast %cst_32 : f32 to vector<16x1xf32>
    %130 = arith.divf %128, %129 : vector<16x1xf32>
    %cst_33 = arith.constant 9.99999974E-6 : f32
    %131 = vector.broadcast %cst_33 : f32 to vector<16x1xf32>
    %132 = arith.addf %130, %131 : vector<16x1xf32>
    %133 = math.rsqrt %132 : vector<16x1xf32>
    %134 = vector.broadcast %133 : vector<16x1xf32> to vector<16x64xf32>
    %135 = arith.mulf %125, %134 : vector<16x64xf32>
    %136 = vector.shape_cast %117 : vector<64xf32> to vector<1x64xf32>
    %137 = vector.broadcast %136 : vector<1x64xf32> to vector<16x64xf32>
    %138 = arith.mulf %135, %137 : vector<16x64xf32>
    %139 = vector.shape_cast %119 : vector<64xf32> to vector<1x64xf32>
    %140 = vector.broadcast %139 : vector<1x64xf32> to vector<16x64xf32>
    %141 = arith.addf %138, %140 : vector<16x64xf32>
    %c0_34 = arith.constant 0 : index
    %c0_35 = arith.constant 0 : index
    %142 = vector.load %arg5[%c0_34, %c0_35] : memref<128x32xf32, #tpu.memory_space<vmem>>, vector<64x32xf32>
    %cst_36 = arith.constant dense<0.000000e+00> : vector<16x32xf32>
    %143 = tpu.matmul %141, %142, %cst_36 {dimension_numbers = #tpu.dot_dimension_numbers<[1], [0], [0], [1], [0, 0, 1, 1], [], []>} : vector<16x64xf32>, vector<64x32xf32>, vector<16x32xf32> -> vector<16x32xf32>
    %144 = vector.extract_strided_slice %0 {offsets = [17, 0], sizes = [1, 32], strides = [1, 1]} : vector<22x192xf32> to vector<1x32xf32>
    %145 = vector.shape_cast %144 : vector<1x32xf32> to vector<32xf32>
    %146 = vector.shape_cast %145 : vector<32xf32> to vector<1x32xf32>
    %147 = vector.broadcast %146 : vector<1x32xf32> to vector<16x32xf32>
    %148 = arith.addf %143, %147 : vector<16x32xf32>
    %c224 = arith.constant 224 : index
    %c0_37 = arith.constant 0 : index
    %149 = vector.load %arg2[%c224, %c0_37] : memref<256x64xf32, #tpu.memory_space<vmem>>, vector<32x64xf32>
    %cst_38 = arith.constant dense<0.000000e+00> : vector<16x64xf32>
    %150 = tpu.matmul %148, %149, %cst_38 {dimension_numbers = #tpu.dot_dimension_numbers<[1], [0], [0], [1], [0, 0, 1, 1], [], []>} : vector<16x32xf32>, vector<32x64xf32>, vector<16x64xf32> -> vector<16x64xf32>
    %151 = vector.extract_strided_slice %0 {offsets = [18, 0], sizes = [1, 64], strides = [1, 1]} : vector<22x192xf32> to vector<1x64xf32>
    %152 = vector.shape_cast %151 : vector<1x64xf32> to vector<64xf32>
    %153 = vector.shape_cast %152 : vector<64xf32> to vector<1x64xf32>
    %154 = vector.broadcast %153 : vector<1x64xf32> to vector<16x64xf32>
    %155 = arith.addf %150, %154 : vector<16x64xf32>
    %156 = vector.extract_strided_slice %0 {offsets = [19, 0], sizes = [1, 64], strides = [1, 1]} : vector<22x192xf32> to vector<1x64xf32>
    %157 = vector.shape_cast %156 : vector<1x64xf32> to vector<64xf32>
    %158 = vector.extract_strided_slice %0 {offsets = [20, 0], sizes = [1, 64], strides = [1, 1]} : vector<22x192xf32> to vector<1x64xf32>
    %159 = vector.shape_cast %158 : vector<1x64xf32> to vector<64xf32>
    %cst_39 = arith.constant dense<0.000000e+00> : vector<16xf32>
    %160 = vector.multi_reduction <add>, %155, %cst_39 [1] : vector<16x64xf32> to vector<16xf32>
    %161 = vector.shape_cast %160 : vector<16xf32> to vector<16x1xf32>
    %cst_40 = arith.constant 6.400000e+01 : f32
    %162 = vector.broadcast %cst_40 : f32 to vector<16x1xf32>
    %163 = arith.divf %161, %162 : vector<16x1xf32>
    %164 = vector.broadcast %163 : vector<16x1xf32> to vector<16x64xf32>
    %165 = arith.subf %155, %164 : vector<16x64xf32>
    %166 = arith.mulf %165, %165 : vector<16x64xf32>
    %cst_41 = arith.constant dense<0.000000e+00> : vector<16xf32>
    %167 = vector.multi_reduction <add>, %166, %cst_41 [1] : vector<16x64xf32> to vector<16xf32>
    %168 = vector.shape_cast %167 : vector<16xf32> to vector<16x1xf32>
    %cst_42 = arith.constant 6.400000e+01 : f32
    %169 = vector.broadcast %cst_42 : f32 to vector<16x1xf32>
    %170 = arith.divf %168, %169 : vector<16x1xf32>
    %cst_43 = arith.constant 9.99999974E-6 : f32
    %171 = vector.broadcast %cst_43 : f32 to vector<16x1xf32>
    %172 = arith.addf %170, %171 : vector<16x1xf32>
    %173 = math.rsqrt %172 : vector<16x1xf32>
    %174 = vector.broadcast %173 : vector<16x1xf32> to vector<16x64xf32>
    %175 = arith.mulf %165, %174 : vector<16x64xf32>
    %176 = vector.shape_cast %157 : vector<64xf32> to vector<1x64xf32>
    %177 = vector.broadcast %176 : vector<1x64xf32> to vector<16x64xf32>
    %178 = arith.mulf %175, %177 : vector<16x64xf32>
    %179 = vector.shape_cast %159 : vector<64xf32> to vector<1x64xf32>
    %180 = vector.broadcast %179 : vector<1x64xf32> to vector<16x64xf32>
    %181 = arith.addf %178, %180 : vector<16x64xf32>
    %cst_44 = arith.constant 5.000000e-01 : f32
    %182 = vector.broadcast %cst_44 : f32 to vector<16x64xf32>
    %183 = arith.mulf %182, %181 : vector<16x64xf32>
    %cst_45 = arith.constant 4.471500e-02 : f32
    %184 = vector.broadcast %cst_45 : f32 to vector<16x64xf32>
    %185 = arith.mulf %184, %181 : vector<16x64xf32>
    %186 = arith.mulf %185, %181 : vector<16x64xf32>
    %187 = arith.mulf %186, %181 : vector<16x64xf32>
    %188 = arith.addf %181, %187 : vector<16x64xf32>
    %cst_46 = arith.constant 0.797884583 : f32
    %189 = vector.broadcast %cst_46 : f32 to vector<16x64xf32>
    %190 = arith.mulf %189, %188 : vector<16x64xf32>
    %191 = math.tanh %190 : vector<16x64xf32>
    %cst_47 = arith.constant 1.000000e+00 : f32
    %192 = vector.broadcast %cst_47 : f32 to vector<16x64xf32>
    %193 = arith.addf %192, %191 : vector<16x64xf32>
    %194 = arith.mulf %183, %193 : vector<16x64xf32>
    %c64 = arith.constant 64 : index
    %c0_48 = arith.constant 0 : index
    %195 = vector.load %arg5[%c64, %c0_48] : memref<128x32xf32, #tpu.memory_space<vmem>>, vector<64x32xf32>
    %cst_49 = arith.constant dense<0.000000e+00> : vector<16x32xf32>
    %196 = tpu.matmul %194, %195, %cst_49 {dimension_numbers = #tpu.dot_dimension_numbers<[1], [0], [0], [1], [0, 0, 1, 1], [], []>} : vector<16x64xf32>, vector<64x32xf32>, vector<16x32xf32> -> vector<16x32xf32>
    %197 = vector.extract_strided_slice %0 {offsets = [21, 0], sizes = [1, 32], strides = [1, 1]} : vector<22x192xf32> to vector<1x32xf32>
    %198 = vector.shape_cast %197 : vector<1x32xf32> to vector<32xf32>
    %199 = vector.shape_cast %198 : vector<32xf32> to vector<1x32xf32>
    %200 = vector.broadcast %199 : vector<1x32xf32> to vector<16x32xf32>
    %201 = arith.addf %196, %200 : vector<16x32xf32>
    %202 = arith.negf %201 : vector<16x32xf32>
    %203 = math.exp %202 : vector<16x32xf32>
    %cst_50 = arith.constant 1.000000e+00 : f32
    %204 = vector.broadcast %cst_50 : f32 to vector<16x32xf32>
    %205 = arith.addf %204, %203 : vector<16x32xf32>
    %206 = arith.divf %204, %205 : vector<16x32xf32>
    %207 = arith.mulf %148, %206 : vector<16x32xf32>
    %c0_51 = arith.constant 0 : index
    %c0_52 = arith.constant 0 : index
    %208 = vector.load %arg7[%c0_51, %c0_52] : memref<16x32xf32, #tpu.memory_space<vmem>>, vector<16x32xf32>
    tpu.vector_store %arg7[%c0_51, %c0_52], %207 {strides = array<i32>} : memref<16x32xf32, #tpu.memory_space<vmem>>, vector<16x32xf32>,
    return
  }
  func.func @transform_0(%arg0: i32) -> (i32, i32) {
    %c0_i32 = arith.constant 0 : i32
    %c0_i32_0 = arith.constant 0 : i32
    return %arg0, %c0_i32 : i32, i32
  }
  func.func @transform_1(%arg0: i32) -> (i32, i32) {
    %c0_i32 = arith.constant 0 : i32
    %c0_i32_0 = arith.constant 0 : i32
    %c0_i32_1 = arith.constant 0 : i32
    return %c0_i32, %c0_i32_0 : i32, i32
  }
  func.func @transform_2(%arg0: i32) -> (i32, i32) {
    %c0_i32 = arith.constant 0 : i32
    %c0_i32_0 = arith.constant 0 : i32
    %c0_i32_1 = arith.constant 0 : i32
    return %c0_i32, %c0_i32_0 : i32, i32
  }
  func.func @transform_3(%arg0: i32) -> (i32, i32) {
    %c0_i32 = arith.constant 0 : i32
    %c0_i32_0 = arith.constant 0 : i32
    %c0_i32_1 = arith.constant 0 : i32
    return %c0_i32, %c0_i32_0 : i32, i32
  }
  func.func @transform_4(%arg0: i32) -> (i32, i32) {
    %c0_i32 = arith.constant 0 : i32
    %c0_i32_0 = arith.constant 0 : i32
    %c0_i32_1 = arith.constant 0 : i32
    return %c0_i32, %c0_i32_0 : i32, i32
  }
  func.func @transform_5(%arg0: i32) -> (i32, i32) {
    %c0_i32 = arith.constant 0 : i32
    %c0_i32_0 = arith.constant 0 : i32
    %c0_i32_1 = arith.constant 0 : i32
    return %c0_i32, %c0_i32_0 : i32, i32
  }
  func.func @transform_6(%arg0: i32) -> (i32, i32) {
    %c0_i32 = arith.constant 0 : i32
    %c0_i32_0 = arith.constant 0 : i32
    return %arg0, %c0_i32 : i32, i32
  }
}

</mosaic_0001>

<bundles_post_ra>
// kernel: tpu_custom_call.1
= control target key start
LH: loop header
LB: loop body
LE: loop exit
PB: predicated region body
PF: predicated region fallthrough
CT: control target
= control target key end

     0   :  { %vm38_vm0 = vcmask 261120   ;;  %s5161_s0 = inlined_call_operand.vmem [shape: f32[16,32], index: 0, kind: input, shape index: {}]   ;;  %s5162_s1 = inlined_call_operand.vmem [shape: f32[256,64], index: 1, kind: input, shape index: {}]   ;;  %s5163_s2 = inlined_call_operand.vmem [shape: f32[64,128], index: 2, kind: input, shape index: {}]   ;;  %s5164_s3 = inlined_call_operand.vmem [shape: f32[64,192], index: 3, kind: input, shape index: {}]   ;;  %s5165_s4 = inlined_call_operand.vmem [shape: f32[128,32], index: 4, kind: input, shape index: {}]   ;;  %s5166_s5 = inlined_call_operand.vmem [shape: f32[22,192], index: 5, kind: input, shape index: {}]   ;;  %s5167_s6 = inlined_call_operand.hbm [shape: f32[16,32], index: 6, kind: output, shape index: {}]  }
   0x1   :  { %v33_v0 = vld [vmem:[%s5162_s1 + $0x18] sm:$0xff]  ;;  %v32_v1 = vld [vmem:[%s5162_s1 + $0x10] sm:$0xff]  ;;  %v28_v2 = vld [vmem:[%s5161_s0] sm:$0xff] }
   0x2   :  { %3893 = vmatprep.subr.mxu1 %v33_v0  ;;  %v31_v3 = vld [vmem:[%s5162_s1 + $0x8] sm:$0xff]  ;;  %3901 = vmatprep.mubr.msk.f32.mxu1 %vm38_vm0, %v28_v2  ;;  %v30_v4 = vld [vmem:[%s5162_s1] sm:$0xff] }
   0x3   :  { %3894 = vmatpush3.msra.mxu1 %v33_v0 }
   0x4   :  { %3895 = vmatprep.subr.mxu1 %v32_v1 }
   0x5   :  { %3896 = vmatpush3.msra.mxu1 %v32_v1 }
   0x6   :  { %11 = vsyncpa [#allocation3], 0  ;;  %3897 = vmatprep.subr.mxu1 %v31_v3  ;;  %v29_v5 = vld [vmem:[%s5161_s0 + $0x8] sm:$0xff]  ;;  %v127_v6 = vld [vmem:[%s5163_s2 + $0x38] sm:$0xff]  ;;  %v34_v14 = vlaneseq  ;;  %vm132_vm1 = vcmask 523264   ;;  %vm4312_vm2 = vmmov 0  }
   0x7   :  { %3898 = vmatpush3.msra.mxu1 %v31_v3  ;;  %v126_v7 = vld [vmem:[%s5163_s2 + $0x30] sm:$0xff]  ;;  %v125_v8 = vld [vmem:[%s5163_s2 + $0x28] sm:$0xff]  ;;  %v124_v9 = vld [vmem:[%s5163_s2 + $0x20] sm:$0xff]  ;;  %vm1823_vm3 = vcmask 64512  }
   0x8   :  { %3899 = vmatprep.subr.mxu1 %v30_v4  ;;  %v123_v10 = vld [vmem:[%s5163_s2 + $0x18] sm:$0xff]  ;;  %v122_v11 = vld [vmem:[%s5163_s2 + $0x10] sm:$0xff]  ;;  %v121_v12 = vld [vmem:[%s5163_s2 + $0x8] sm:$0xff]  ;;  %v4395_v15 = vshrl.u32 %v34_v14, 7 }
   0x9   :  { %3900 = vmatpush3.msra.mxu1 %v30_v4  ;;  %v120_v13 = vld [vmem:[%s5163_s2] sm:$0xff]  ;;  %v4403_v17 = vld [vmem:[%s5166_s5 + $0x10] sm:$0xff]  ;;  %v282_v37 = vld [vmem:[%s5162_s1 + $0x98] sm:$0xff] }
   0xa   :  { %3902 = vmatmul.mubr.msk.f32.vlgmr.msra.gmra.mxu1 %vm38_vm0, %v29_v5  ;;  %3904 = vmatprep.subr.mxu1 %v127_v6  ;;  %v4398_v16 = vsub.s32 0, %v4395_v15  ;;  %v130_v23 = vsub.s32 1, %v4395_v15  ;;  %v281_v38 = vld [vmem:[%s5162_s1 + $0x90] sm:$0xff]  ;;  %v280_v39 = vld [vmem:[%s5162_s1 + $0x88] sm:$0xff]  ;;  %v279_v40 = vld [vmem:[%s5162_s1 + $0x80] sm:$0xff]  ;;  %v239_v4 = vsub.s32 2, %v4395_v15 }
   0xb   :  { %3905 = vmatpush3.msra.mxu1 %v127_v6  ;;  %3923 = vmatprep.subr.mxu0 %v282_v37  ;;  %v278_v41 = vld [vmem:[%s5162_s1 + $0x78] sm:$0xff]  ;;  %v277_v42 = vld [vmem:[%s5162_s1 + $0x70] sm:$0xff]  ;;  %v276_v43 = vld [vmem:[%s5162_s1 + $0x68] sm:$0xff]  ;;  %v245_v5 = vsub.s32 3, %v4395_v15 }
   0xc   :  { %3906 = vmatprep.subr.mxu1 %v126_v7  ;;  %v37_v18 = vrot.slane %v4403_v17, %v4398_v16  ;;  %v131_v25 = vrot.slane %v4403_v17, %v130_v23  ;;  %3924 = vmatpush3.msra.mxu0 %v282_v37  ;;  %v275_v44 = vld [vmem:[%s5162_s1 + $0x60] sm:$0xff]  ;;  %v274_v45 = vld [vmem:[%s5162_s1 + $0x58] sm:$0xff]  ;;  %v273_v46 = vld [vmem:[%s5162_s1 + $0x50] sm:$0xff]  ;;  %v240_v6 = vrot.slane %v4403_v17, %v239_v4 }
   0xd   :  { %3907 = vmatpush3.msra.mxu1 %v126_v7  ;;  %3925 = vmatprep.subr.mxu0 %v281_v38  ;;  %v272_v47 = vld [vmem:[%s5162_s1 + $0x48] sm:$0xff]  ;;  %v271_v48 = vld [vmem:[%s5162_s1 + $0x40] sm:$0xff]  ;;  %v270_v49 = vld [vmem:[%s5162_s1 + $0x38] sm:$0xff] }
   0xe   :  { %3908 = vmatprep.subr.mxu1 %v125_v8  ;;  %3926 = vmatpush3.msra.mxu0 %v281_v38  ;;  %v269_v50 = vld [vmem:[%s5162_s1 + $0x30] sm:$0xff]  ;;  %v268_v51 = vld [vmem:[%s5162_s1 + $0x28] sm:$0xff]  ;;  %v267_v52 = vld [vmem:[%s5162_s1 + $0x20] sm:$0xff] }
   0xf   :  { %3909 = vmatpush3.msra.mxu1 %v125_v8  ;;  %3927 = vmatprep.subr.mxu0 %v280_v39  ;;  %v379_v53 = vld [vmem:[%s5164_s3 + $0x78] sm:$0xff]  ;;  %v378_v54 = vld [vmem:[%s5164_s3 + $0x70] sm:$0xff]  ;;  %v377_v55 = vld [vmem:[%s5164_s3 + $0x68] sm:$0xff] }
  0x10   :  { %3910 = vmatprep.subr.mxu1 %v124_v9  ;;  %3928 = vmatpush3.msra.mxu0 %v280_v39  ;;  %v376_v56 = vld [vmem:[%s5164_s3 + $0x60] sm:$0xff]  ;;  %v375_v57 = vld [vmem:[%s5164_s3 + $0x58] sm:$0xff]  ;;  %v374_v58 = vld [vmem:[%s5164_s3 + $0x50] sm:$0xff] }
  0x11   :  { %3911 = vmatpush3.msra.mxu1 %v124_v9  ;;  %3929 = vmatprep.subr.mxu0 %v279_v40  ;;  %v373_v59 = vld [vmem:[%s5164_s3 + $0x48] sm:$0xff]  ;;  %v372_v60 = vld [vmem:[%s5164_s3 + $0x40] sm:$0xff]  ;;  %v371_v61 = vld [vmem:[%s5164_s3 + $0x38] sm:$0xff]  ;;  %v246_v9 = vrot.slane %v4403_v17, %v245_v5 }
  0x12   :  { %3912 = vmatprep.subr.mxu1 %v123_v10  ;;  %3930 = vmatpush3.msra.mxu0 %v279_v40  ;;  %v370_v40 = vld [vmem:[%s5164_s3 + $0x30] sm:$0xff] }
  0x13   :  { %3913 = vmatpush3.msra.mxu1 %v123_v10  ;;  %3931 = vmatprep.subr.mxu0 %v278_v41 }
  0x14   :  { %3914 = vmatprep.subr.mxu1 %v122_v11  ;;  %3932 = vmatpush3.msra.mxu0 %v278_v41  ;;  %v369_v41 = vld [vmem:[%s5164_s3 + $0x28] sm:$0xff] }
  0x15   :  { %3915 = vmatpush3.msra.mxu1 %v122_v11  ;;  %3933 = vmatprep.subr.mxu0 %v277_v42 }
  0x16   :  { %3916 = vmatprep.subr.mxu1 %v121_v12  ;;  %3934 = vmatpush3.msra.mxu0 %v277_v42  ;;  %v368_v42 = vld [vmem:[%s5164_s3 + $0x20] sm:$0xff] }
  0x17   :  { %3917 = vmatpush3.msra.mxu1 %v121_v12  ;;  %3935 = vmatprep.subr.mxu0 %v276_v43 }
  0x18   :  { %3918 = vmatprep.subr.mxu1 %v120_v13  ;;  %3936 = vmatpush3.msra.mxu0 %v276_v43  ;;  %v367_v43 = vld [vmem:[%s5164_s3 + $0x18] sm:$0xff] }
  0x19   :  { %3919 = vmatpush3.msra.mxu1 %v120_v13  ;;  %3937 = vmatprep.subr.mxu0 %v275_v44 }
  0x1a   :  { %3938 = vmatpush3.msra.mxu0 %v275_v44  ;;  %410 = vmatprep.subr.mxu1 %v379_v53  ;;  %v366_v44 = vld [vmem:[%s5164_s3 + $0x10] sm:$0xff] }
  0x1b   :  { %3939 = vmatprep.subr.mxu0 %v274_v45 }
  0x1c   :  { %3940 = vmatpush3.msra.mxu0 %v274_v45  ;;  %v365_v45 = vld [vmem:[%s5164_s3 + $0x8] sm:$0xff] }
  0x1d   :  { %3941 = vmatprep.subr.mxu0 %v273_v46 }
  0x1e   :  { %3942 = vmatpush3.msra.mxu0 %v273_v46  ;;  %v364_v46 = vld [vmem:[%s5164_s3] sm:$0xff]  ;;  %s4311_s3 = smov 64  }
  0x1f   :  { %3943 = vmatprep.subr.mxu0 %v272_v47 }
  0x20   :  { %3944 = vmatpush3.msra.mxu0 %v272_v47  ;;  %v4309_v47 = vmov 0.0  }
  0x21   :  { %3945 = vmatprep.subr.mxu0 %v271_v48 }
  0x22   :  { %3946 = vmatpush3.msra.mxu0 %v271_v48  ;;  %v4310_v48 = vmov 1966171168  }
  0x23   :  { %3947 = vmatprep.subr.mxu0 %v270_v49 }
  0x24   :  { %3948 = vmatpush3.msra.mxu0 %v270_v49  ;;  %v474_v49 = vunpack.c.l.s4 %v4310_v48 }
  0x25   :  { %3949 = vmatprep.subr.mxu0 %v269_v50 }
  0x26   :  { %3950 = vmatpush3.msra.mxu0 %v269_v50  ;;  %v24_v50 = vld [vmem:[%s5166_s5] sm:$0xff] }
  0x27   :  { %3951 = vmatprep.subr.mxu0 %v268_v51 }
  0x28   :  { %3952 = vmatpush3.msra.mxu0 %v268_v51  ;;  %v475_v51 = vunpack.c.0.s8 %v474_v49 }
  0x29   :  { %3953 = vmatprep.subr.mxu0 %v267_v52 }
  0x2a   :  { %3954 = vmatpush3.msra.mxu0 %v267_v52  ;;  %v472_v52 = vcombine.high %v24_v50, %v24_v50  ;;  %v478_v53 = vsub.s32 %v475_v51, %v4395_v15 }
  0x2b   :  { %3963 = vmatprep.subr.mxu0 %v4309_v47 }
  0xca   :  { %v3903_v19 = vpop.f32.mrf.mxu1 }
  0xcb   :  { %v4409_v22 = vadd.f32 %v3903_v19, %v37_v18 }
  0xcc   :  { %v111_v20 = vpop.f32.mrf.mxu1 }
  0xcd   :  { %v4407_v21 = vadd.f32 %v111_v20, %v37_v18 }
  0xcf   :  { %3920 = vmatprep.mubr.msk.f32.mxu1 %vm132_vm1, %v4407_v21 }
  0xd0   :  { %3921 = vmatmul.mubr.msk.f32.vlgmr.msra.gmra.mxu1 %vm132_vm1, %v4409_v22 }
  0xd1   :  { %411 = vmatpush1.msra.mxu1 %v378_v54  ;;  %458 = vmatprep.mubr.f32.mxu1 %v4309_v47  ;;  %v479_v54 = vrot.slane %v24_v50, %v478_v53 }
  0xd2   :  { %412 = vmatprep.subr.mxu1 %v377_v55  ;;  %v486_v55 = vrot.slane %v472_v52, %v478_v53 }
  0xd3   :  { %413 = vmatpush1.msra.mxu1 %v376_v56  ;;  %v487_v56 = vcombine.high %v479_v54, %v479_v54 }
  0xd4   :  { %414 = vmatprep.subr.mxu1 %v375_v57  ;;  %v495_v57 = vrot.slane %v479_v54, %v478_v53 }
  0xd5   :  { %415 = vmatpush1.msra.mxu1 %v374_v58  ;;  %v502_v58 = vrot.slane %v486_v55, %v478_v53 }
  0xd6   :  { %416 = vmatprep.subr.mxu1 %v373_v59  ;;  %v509_v59 = vrot.slane %v487_v56, %v478_v53 }
  0xd7   :  { %417 = vmatpush1.msra.mxu1 %v372_v60  ;;  %v517_v60 = vcombine.high %v495_v57, %v495_v57 }
  0xd8   :  { %418 = vmatprep.subr.mxu1 %v371_v61  ;;  %v4541_v61 = vrot.slane %v495_v57, %v4398_v16 }
  0xd9   :  { %419 = vmatpush1.msra.mxu1 %v370_v40 }
  0xda   :  { %420 = vmatprep.subr.mxu1 %v369_v41 }
  0xdb   :  { %421 = vmatpush1.msra.mxu1 %v368_v42 }
  0xdc   :  { %422 = vmatprep.subr.mxu1 %v367_v43 }
  0xdd   :  { %423 = vmatpush1.msra.mxu1 %v366_v44 }
  0xde   :  { %424 = vmatprep.subr.mxu1 %v365_v45 }
  0xdf   :  { %425 = vmatpush1.msra.mxu1 %v364_v46 }
  0xe0   :  { %3958 = vmatprep.subr.mxu1 %v4309_v47 }
 0x190   :  { %v3922_v24 = vpop.f32.mrf.mxu1 }
 0x191   :  { %v211_v28 = vadd.f32 %v3922_v24, %v131_v25 }
 0x192   :  { %v205_v26 = vpop.f32.mrf.mxu1 }
 0x193   :  { %v206_v27 = vadd.f32 %v205_v26, %v131_v25 }
 0x195   :  { %214 = vadd.xlane.f32.xlu0 %v206_v27 }
 0x199   :  { %216 = vadd.xlane.f32.xlu0 %v211_v28 }
 0x1af   :  { %561 = vrot.lane.b32.xlu0 %v4541_v61, %s4311_s3 }
 0x21e   :  { %v215_v29 = vpop.xlane.xlu0 %214 }
 0x21f   :  { %v219_v30 = vmul.f32 0.0078125, %v215_v29 }
 0x221   :  { %v4419_v31 = vsub.f32 %v206_v27, %v219_v30 }
 0x222   :  { %v217_v32 = vpop.xlane.xlu0 %216 }
 0x223   :  { %v220_v33 = vmul.f32 0.0078125, %v217_v32  ;;  %v223_v34 = vmul.f32 %v4419_v31, %v4419_v31 }
 0x225   :  { %v4423_v35 = vsub.f32 %v211_v28, %v220_v33  ;;  %225 = vadd.xlane.f32.xlu1 %v223_v34 }
 0x227   :  { %v224_v36 = vmul.f32 %v4423_v35, %v4423_v35 }
 0x229   :  { %227 = vadd.xlane.f32.xlu1 %v224_v36 }
 0x2ae   :  { %v226_v62 = vpop.xlane.xlu1 %225 }
 0x2af   :  { %v229_v63 = vmul.f32 0.0078125, %v226_v62  ;;  %v4544_v62 = vrot.slane %v509_v59, %v4398_v16 }
 0x2b1   :  { %v231_v0 = vadd.f32 1e-05, %v229_v63  ;;  %v4549_v63 = vrot.slane %v502_v58, %v4398_v16  ;;  %563 = vrot.lane.b32.xlu1 %v4544_v62, %s4311_s3 }
 0x2b2   :  { %v228_v1 = vpop.xlane.xlu1 %227 }
 0x2b3   :  { %4194 = vrsqrt.f32 %v231_v0  ;;  %v230_v2 = vmul.f32 0.0078125, %v228_v1  ;;  %v518_v0 = vcombine.high %v502_v58, %v502_v58  ;;  %v4554_v1 = vrot.slane %v517_v60, %v4398_v16  ;;  %569 = vrot.lane.b32.xlu0 %v4549_v63, %s4311_s3 }
 0x2b5   :  { %v232_v3 = vadd.f32 1e-05, %v230_v2  ;;  %v519_v2 = vcombine.high %v509_v59, %v509_v59  ;;  %565 = vrot.lane.b32.xlu1 %v4554_v1, %s4311_s3 }
 0x2b7   :  { %4196 = vrsqrt.f32 %v232_v3  ;;  %v488_v3 = vcombine.high %v486_v55, %v486_v55 }
 0x2c0   :  { %v4195_v7 = vpop.eup %4194 }
 0x2c1   :  { %v235_v8 = vmul.f32 %v4195_v7, %v4419_v31  ;;  %v4564_v7 = vrot.slane %v519_v2, %v4398_v16 }
 0x2c3   :  { %v241_v10 = vmul.f32 %v240_v6, %v235_v8  ;;  %v516_v8 = vrot.slane %v488_v3, %v478_v53  ;;  %567 = vrot.lane.b32.xlu1 %v4564_v7, %s4311_s3 }
 0x2c4   :  { %v4197_v11 = vpop.eup %4196 }
 0x2c5   :  { %v236_v12 = vmul.f32 %v4197_v11, %v4423_v35  ;;  %v247_v13 = vadd.f32 %v246_v9, %v241_v10  ;;  %v520_v10 = vcombine.high %v516_v8, %v516_v8 }
 0x2c7   :  { %v242_v14 = vmul.f32 %v240_v6, %v236_v12  ;;  %v251_v18 = vmul.f32 0.044715, %v247_v13  ;;  %v249_v33 = vmul.f32 0.5, %v247_v13  ;;  %v4559_v6 = vrot.slane %v518_v0, %v4398_v16 }
 0x2c8   :  { %v4576_v11 = vrot.slane %v520_v10, %v4398_v16  ;;  %v285_v12 = vsub.s32 4, %v4395_v15  ;;  %v26_v10 = vld [vmem:[%s5166_s5 + $0x18] sm:$0xff] }
 0x2c9   :  { %v253_v19 = vmul.f32 %v251_v18, %v247_v13  ;;  %v248_v20 = vadd.f32 %v246_v9, %v242_v14  ;;  %573 = vrot.lane.b32.xlu0 %v4559_v6, %s4311_s3  ;;  %v4571_v9 = vrot.slane %v516_v8, %v4398_v16 }
 0x2ca   :  { %v286_v14 = vrot.slane %v4403_v17, %v285_v12 }
 0x2cb   :  { %v255_v24 = vmul.f32 %v253_v19, %v247_v13  ;;  %v252_v25 = vmul.f32 0.044715, %v248_v20  ;;  %v250_v37 = vmul.f32 0.5, %v248_v20  ;;  %571 = vrot.lane.b32.xlu1 %v4571_v9, %s4311_s3 }
 0x2cd   :  { %v257_v26 = vadd.f32 %v255_v24, %v247_v13  ;;  %v254_v27 = vmul.f32 %v252_v25, %v248_v20 }
 0x2cf   :  { %v259_v28 = vmul.f32 0.7978846, %v257_v26  ;;  %v256_v29 = vmul.f32 %v254_v27, %v248_v20  ;;  %575 = vrot.lane.b32.xlu1 %v4576_v11, %s4311_s3  ;;  %v4596_v27 = vsub.s32 5, %v4395_v15 }
 0x2d1   :  { %4198 = vtanh.f32 %v259_v28  ;;  %v258_v30 = vadd.f32 %v256_v29, %v248_v20  ;;  %v383_v28 = vrot.slane %v4403_v17, %v4596_v27 }
 0x2d3   :  { %v260_v31 = vmul.f32 0.7978846, %v258_v30 }
 0x2d5   :  { %4200 = vtanh.f32 %v260_v31 }
 0x2de   :  { %v4199_v32 = vpop.eup %4198 }
 0x2df   :  { %v263_v34 = vadd.f32 1.0, %v4199_v32 }
 0x2e1   :  { %v265_v36 = vmul.f32 %v263_v34, %v249_v33 }
 0x2e2   :  { %v4201_v35 = vpop.eup %4200 }
 0x2e3   :  { %3955 = vmatprep.mubr.f32.mxu0 %v265_v36  ;;  %v264_v38 = vadd.f32 1.0, %v4201_v35 }
 0x2e5   :  { %v266_v39 = vmul.f32 %v264_v38, %v250_v37 }
 0x2e7   :  { %3956 = vmatmul.mubr.f32.vlgmr.msra.gmra.mxu0 %v266_v39 }
 0x2e8   :  { %3965 = vmatprep.mubr.msk.f32.mxu0 %vm4312_vm2, %v4309_v47 }
 0x323   :  { %v564_v26 = vpop.permute.xlu1 %563 }
 0x3a7   :  { %v3957_v13 = vpop.f32.mrf.mxu0 }
 0x3a8   :  { %v359_v20 = vadd.f32 %v3957_v13, %v286_v14 }
 0x3a9   :  { %v353_v18 = vpop.f32.mrf.mxu0 }
 0x3aa   :  { %v354_v19 = vadd.f32 %v353_v18, %v286_v14  ;;  %v4591_v25 = vadd.f32 %v359_v20, %v4409_v22  ;;  %v562_v22 = vpop.permute.xlu0 %561  ;;  %v4706_v18 = vrot.slane %v26_v10, %v4596_v27 }
 0x3ac   :  { %v4585_v24 = vadd.f32 %v354_v19, %v4407_v21  ;;  %v566_v21 = vpop.permute.xlu1 %565 }
 0x3ae   :  { %3699 = vmatmul.mubr.msk.f32.vlgmr.msra.gmra.mxu1 %vm132_vm1, %v4585_v24  ;;  %v570_v34 = vpop.permute.xlu0 %569 }
 0x3af   :  { %464 = vmatprep.mubr.f32.mxu1 %v4309_v47 }
 0x3b0   :  { %v568_v30 = vpop.permute.xlu1 %567 }
 0x3b2   :  { %3700 = vmatmul.mubr.msk.f32.gmra.mxu1 %vm132_vm1, %v4591_v25  ;;  %v574_v39 = vpop.permute.xlu0 %573 }
 0x3b3   :  { %3960 = vmatprep.mubr.msk.f32.mxu1 %vm4312_vm2, %v4309_v47 }
 0x3b4   :  { %v572_v36 = vpop.permute.xlu1 %571 }
 0x3b8   :  { %v576_v42 = vpop.permute.xlu1 %575 }
 0x46e   :  { %v460_v29 = vpop.f32.mrf.mxu1 }
 0x46f   :  { %v4604_v31 = vadd.f32 %v460_v29, %v383_v28 }
 0x470   :  { %v4611_v37 = vpop.f32.mrf.mxu1 }
 0x471   :  { %v585_v32 = vmul.f32 %v562_v22, %v4604_v31  ;;  %v586_v33 = vmul.f32 %v564_v26, %v4604_v31  ;;  %v587_v35 = vmul.f32 %v566_v21, %v4604_v31  ;;  %v588_v17 = vmul.f32 %v568_v30, %v4604_v31 }
 0x472   :  { %v589_v38 = vmul.f32 %v570_v34, %v4604_v31  ;;  %v466_v40 = vpop.f32.mrf.mxu1  ;;  %v590_v41 = vmul.f32 %v572_v36, %v4604_v31  ;;  %v591_v43 = vmul.f32 %v574_v39, %v4604_v31  ;;  %v592_v45 = vmul.f32 %v576_v42, %v4604_v31 }
 0x473   :  { %618 = vrot.lane.b32.xlu0 %v585_v32, %s4311_s3  ;;  %696 = vrot.lane.b32.xlu1 %v586_v33, %s4311_s3  ;;  %v4621_v44 = vadd.f32 %v466_v40, %v383_v28 }
 0x475   :  { %v593_v46 = vmul.f32 %v562_v22, %v4621_v44  ;;  %v594_v48 = vmul.f32 %v564_v26, %v4621_v44  ;;  %v595_v49 = vmul.f32 %v566_v21, %v4621_v44  ;;  %v596_v50 = vmul.f32 %v568_v30, %v4621_v44  ;;  %v4754_v30 = vpop.f32.mrf.mxu1 }
 0x476   :  { %v597_v51 = vmul.f32 %v570_v34, %v4621_v44  ;;  %v598_v52 = vmul.f32 %v572_v36, %v4621_v44  ;;  %v599_v53 = vmul.f32 %v574_v39, %v4621_v44  ;;  %v600_v54 = vmul.f32 %v576_v42, %v4621_v44 }
 0x477   :  { %771 = vrot.lane.b32.xlu0 %v587_v35, %s4311_s3  ;;  %846 = vrot.lane.b32.xlu1 %v588_v17, %s4311_s3  ;;  %v4722_v26 = vadd.f32 %v4611_v37, %v4706_v18 }
 0x479   :  { %v601_v22 = vmul.f32 %v4541_v61, %v4722_v26  ;;  %v602_v29 = vmul.f32 %v4544_v62, %v4722_v26 }
 0x47b   :  { %921 = vrot.lane.b32.xlu0 %v589_v38, %s4311_s3  ;;  %996 = vrot.lane.b32.xlu1 %v590_v41, %s4311_s3 }
 0x47f   :  { %1071 = vrot.lane.b32.xlu0 %v591_v43, %s4311_s3  ;;  %1146 = vrot.lane.b32.xlu1 %v592_v45, %s4311_s3 }
 0x483   :  { %1221 = vrot.lane.b32.xlu0 %v593_v46, %s4311_s3  ;;  %1299 = vrot.lane.b32.xlu1 %v594_v48, %s4311_s3 }
 0x487   :  { %1374 = vrot.lane.b32.xlu0 %v595_v49, %s4311_s3  ;;  %1449 = vrot.lane.b32.xlu1 %v596_v50, %s4311_s3 }
 0x48b   :  { %1524 = vrot.lane.b32.xlu0 %v597_v51, %s4311_s3  ;;  %1599 = vrot.lane.b32.xlu1 %v598_v52, %s4311_s3 }
 0x48f   :  { %1674 = vrot.lane.b32.xlu0 %v599_v53, %s4311_s3  ;;  %1749 = vrot.lane.b32.xlu1 %v600_v54, %s4311_s3 }
 0x4e5   :  { %v619_v55 = vpop.permute.xlu0 %618  ;;  %v697_v56 = vpop.permute.xlu1 %696 }
 0x4e6   :  { %3959 = vmatpush3.xpose.msk.msra.mxu1 %vm132_vm1, %v619_v55  ;;  %3964 = vmatpush3.xpose.msk.msra.mxu0 %vm132_vm1, %v697_v56 }
 0x4e7   :  { %3968 = vmatprep.subr.mxu1 %v4309_v47  ;;  %3973 = vmatprep.subr.mxu0 %v4309_v47 }
 0x4e9   :  { %3961 = vmatmul.mubr.msk.f32.vlgmr.msra.gmra.mxu1 %vm132_vm1, %v4604_v31  ;;  %v772_v57 = vpop.permute.xlu0 %771  ;;  %3966 = vmatmul.mubr.msk.f32.vlgmr.msra.gmra.mxu0 %vm132_vm1, %v4604_v31  ;;  %v847_v58 = vpop.permute.xlu1 %846 }
 0x4ea   :  { %3969 = vmatpush3.xpose.msk.msra.mxu1 %vm132_vm1, %v772_v57  ;;  %3974 = vmatpush3.xpose.msk.msra.mxu0 %vm132_vm1, %v847_v58 }
 0x4eb   :  { %3970 = vmatprep.mubr.msk.f32.mxu1 %vm4312_vm2, %v4309_v47  ;;  %3975 = vmatprep.mubr.msk.f32.mxu0 %vm4312_vm2, %v4309_v47 }
 0x4ec   :  { %3978 = vmatprep.subr.mxu1 %v4309_v47  ;;  %3983 = vmatprep.subr.mxu0 %v4309_v47 }
 0x4ed   :  { %3971 = vmatmul.mubr.msk.f32.vlgmr.msra.gmra.mxu1 %vm132_vm1, %v4604_v31  ;;  %v922_v59 = vpop.permute.xlu0 %921  ;;  %3976 = vmatmul.mubr.msk.f32.vlgmr.msra.gmra.mxu0 %vm132_vm1, %v4604_v31  ;;  %v997_v60 = vpop.permute.xlu1 %996 }
 0x4ee   :  { %3979 = vmatpush3.xpose.msk.msra.mxu1 %vm132_vm1, %v922_v59  ;;  %3984 = vmatpush3.xpose.msk.msra.mxu0 %vm132_vm1, %v997_v60 }
 0x4ef   :  { %3980 = vmatprep.mubr.msk.f32.mxu1 %vm4312_vm2, %v4309_v47  ;;  %3985 = vmatprep.mubr.msk.f32.mxu0 %vm4312_vm2, %v4309_v47 }
 0x4f0   :  { %3988 = vmatprep.subr.mxu1 %v4309_v47  ;;  %3993 = vmatprep.subr.mxu0 %v4309_v47 }
 0x4f1   :  { %3981 = vmatmul.mubr.msk.f32.vlgmr.msra.gmra.mxu1 %vm132_vm1, %v4604_v31  ;;  %v1072_v0 = vpop.permute.xlu0 %1071  ;;  %3986 = vmatmul.mubr.msk.f32.vlgmr.msra.gmra.mxu0 %vm132_vm1, %v4604_v31  ;;  %v1147_v2 = vpop.permute.xlu1 %1146 }
 0x4f2   :  { %3989 = vmatpush3.xpose.msk.msra.mxu1 %vm132_vm1, %v1072_v0  ;;  %3994 = vmatpush3.xpose.msk.msra.mxu0 %vm132_vm1, %v1147_v2 }
 0x4f3   :  { %3990 = vmatprep.mubr.msk.f32.mxu1 %vm4312_vm2, %v4309_v47  ;;  %3995 = vmatprep.mubr.msk.f32.mxu0 %vm4312_vm2, %v4309_v47 }
 0x4f4   :  { %3998 = vmatprep.subr.mxu1 %v4309_v47  ;;  %4003 = vmatprep.subr.mxu0 %v4309_v47 }
 0x4f5   :  { %3991 = vmatmul.mubr.msk.f32.vlgmr.msra.gmra.mxu1 %vm132_vm1, %v4604_v31  ;;  %v1222_v3 = vpop.permute.xlu0 %1221  ;;  %3996 = vmatmul.mubr.msk.f32.vlgmr.msra.gmra.mxu0 %vm132_vm1, %v4604_v31  ;;  %v1300_v8 = vpop.permute.xlu1 %1299 }
 0x4f6   :  { %3999 = vmatpush3.xpose.msk.msra.mxu1 %vm132_vm1, %v1222_v3  ;;  %4004 = vmatpush3.xpose.msk.msra.mxu0 %vm132_vm1, %v1300_v8 }
 0x4f7   :  { %4000 = vmatprep.mubr.msk.f32.mxu1 %vm4312_vm2, %v4309_v47  ;;  %4005 = vmatprep.mubr.msk.f32.mxu0 %vm4312_vm2, %v4309_v47 }
 0x4f8   :  { %4008 = vmatprep.subr.mxu1 %v4309_v47  ;;  %4013 = vmatprep.subr.mxu0 %v4309_v47 }
 0x4f9   :  { %4001 = vmatmul.mubr.msk.f32.vlgmr.msra.gmra.mxu1 %vm132_vm1, %v4621_v44  ;;  %v1375_v13 = vpop.permute.xlu0 %1374  ;;  %4006 = vmatmul.mubr.msk.f32.vlgmr.msra.gmra.mxu0 %vm132_vm1, %v4621_v44  ;;  %v1450_v14 = vpop.permute.xlu1 %1449 }
 0x4fa   :  { %4009 = vmatpush3.xpose.msk.msra.mxu1 %vm132_vm1, %v1375_v13  ;;  %4014 = vmatpush3.xpose.msk.msra.mxu0 %vm132_vm1, %v1450_v14 }
 0x4fb   :  { %4010 = vmatprep.mubr.msk.f32.mxu1 %vm4312_vm2, %v4309_v47  ;;  %4015 = vmatprep.mubr.msk.f32.mxu0 %vm4312_vm2, %v4309_v47 }
 0x4fc   :  { %4018 = vmatprep.subr.mxu1 %v4309_v47  ;;  %4023 = vmatprep.subr.mxu0 %v4309_v47 }
 0x4fd   :  { %4011 = vmatmul.mubr.msk.f32.vlgmr.msra.gmra.mxu1 %vm132_vm1, %v4621_v44  ;;  %v1525_v19 = vpop.permute.xlu0 %1524  ;;  %4016 = vmatmul.mubr.msk.f32.vlgmr.msra.gmra.mxu0 %vm132_vm1, %v4621_v44  ;;  %v1600_v20 = vpop.permute.xlu1 %1599 }
 0x4fe   :  { %4019 = vmatpush3.xpose.msk.msra.mxu1 %vm132_vm1, %v1525_v19  ;;  %4024 = vmatpush3.xpose.msk.msra.mxu0 %vm132_vm1, %v1600_v20 }
 0x4ff   :  { %4020 = vmatprep.mubr.msk.f32.mxu1 %vm4312_vm2, %v4309_v47  ;;  %4025 = vmatprep.mubr.msk.f32.mxu0 %vm4312_vm2, %v4309_v47 }
 0x500   :  { %4028 = vmatprep.subr.mxu1 %v4309_v47  ;;  %4033 = vmatprep.subr.mxu0 %v4309_v47 }
 0x501   :  { %4021 = vmatmul.mubr.msk.f32.vlgmr.msra.gmra.mxu1 %vm132_vm1, %v4621_v44  ;;  %v1675_v21 = vpop.permute.xlu0 %1674  ;;  %4026 = vmatmul.mubr.msk.f32.vlgmr.msra.gmra.mxu0 %vm132_vm1, %v4621_v44  ;;  %v1750_v28 = vpop.permute.xlu1 %1749 }
 0x502   :  { %4029 = vmatpush3.xpose.msk.msra.mxu1 %vm132_vm1, %v1675_v21  ;;  %4034 = vmatpush3.xpose.msk.msra.mxu0 %vm132_vm1, %v1750_v28 }
 0x503   :  { %4030 = vmatprep.mubr.msk.f32.mxu1 %vm4312_vm2, %v4309_v47  ;;  %4035 = vmatprep.mubr.msk.f32.mxu0 %vm4312_vm2, %v4309_v47 }
 0x504   :  { %4038 = vmatprep.subr.mxu1 %v4309_v47  ;;  %4043 = vmatprep.subr.mxu0 %v4309_v47 }
 0x505   :  { %4031 = vmatmul.mubr.msk.f32.vlgmr.msra.gmra.mxu1 %vm132_vm1, %v4621_v44  ;;  %4036 = vmatmul.mubr.msk.f32.vlgmr.msra.gmra.mxu0 %vm132_vm1, %v4621_v44 }
 0x506   :  { %4039 = vmatpush3.msra.mxu1 %v601_v22  ;;  %4044 = vmatpush3.msra.mxu0 %v602_v29 }
 0x507   :  { %4040 = vmatprep.mubr.msk.f32.mxu1 %vm4312_vm2, %v4309_v47  ;;  %4048 = vmatprep.subr.mxu1 %v4309_v47 }
 0x508   :  { %4045 = vmatprep.mubr.msk.f32.mxu0 %vm4312_vm2, %v4309_v47  ;;  %4053 = vmatprep.subr.mxu0 %v4309_v47 }
 0x5a9   :  { %v4756_v31 = vpop.f32.mrf.mxu1  ;;  %v4758_v32 = vpop.f32.mrf.mxu0 }
 0x5aa   :  { %v1824_v33 = vsel %vm1823_vm3, %v4756_v31, -inf  ;;  %v1827_v36 = vsel %vm1823_vm3, %v4758_v32, -inf }
 0x5ab   :  { %1825 = vmax.xlane.f32.xlu0 %v1824_v33  ;;  %v3962_v34 = vpop.f32.mrf.mxu1  ;;  %1828 = vmax.xlane.f32.xlu1 %v1827_v36  ;;  %v3967_v35 = vpop.f32.mrf.mxu0 }
 0x5ad   :  { %v4764_v37 = vpop.f32.mrf.mxu1  ;;  %v4766_v17 = vpop.f32.mrf.mxu0 }
 0x5ae   :  { %v1830_v38 = vsel %vm1823_vm3, %v4764_v37, -inf  ;;  %v1833_v43 = vsel %vm1823_vm3, %v4766_v17, -inf }
 0x5af   :  { %1831 = vmax.xlane.f32.xlu0 %v1830_v38  ;;  %v3972_v39 = vpop.f32.mrf.mxu1  ;;  %v3977_v40 = vpop.f32.mrf.mxu0 }
 0x5b1   :  { %v4770_v41 = vpop.f32.mrf.mxu1  ;;  %v4772_v42 = vpop.f32.mrf.mxu0 }
 0x5b2   :  { %v1839_v45 = vsel %vm1823_vm3, %v4772_v42, -inf  ;;  %v1836_v50 = vsel %vm1823_vm3, %v4770_v41, -inf }
 0x5b3   :  { %v3982_v44 = vpop.f32.mrf.mxu1  ;;  %1834 = vmax.xlane.f32.xlu0 %v1833_v43  ;;  %1840 = vmax.xlane.f32.xlu1 %v1839_v45  ;;  %v3987_v46 = vpop.f32.mrf.mxu0 }
 0x5b5   :  { %v4778_v48 = vpop.f32.mrf.mxu1  ;;  %v4780_v49 = vpop.f32.mrf.mxu0 }
 0x5b6   :  { %v1845_v52 = vsel %vm1823_vm3, %v4780_v49, -inf  ;;  %v1842_v56 = vsel %vm1823_vm3, %v4778_v48, -inf }
 0x5b7   :  { %v3992_v51 = vpop.f32.mrf.mxu1  ;;  %1837 = vmax.xlane.f32.xlu0 %v1836_v50  ;;  %1846 = vmax.xlane.f32.xlu1 %v1845_v52  ;;  %v3997_v53 = vpop.f32.mrf.mxu0 }
 0x5b9   :  { %v4786_v54 = vpop.f32.mrf.mxu1  ;;  %v4788_v55 = vpop.f32.mrf.mxu0 }
 0x5ba   :  { %v1851_v58 = vsel %vm1823_vm3, %v4788_v55, -inf  ;;  %v1848_v2 = vsel %vm1823_vm3, %v4786_v54, -inf }
 0x5bb   :  { %v4002_v57 = vpop.f32.mrf.mxu1  ;;  %1843 = vmax.xlane.f32.xlu0 %v1842_v56  ;;  %1852 = vmax.xlane.f32.xlu1 %v1851_v58  ;;  %v4007_v59 = vpop.f32.mrf.mxu0 }
 0x5bd   :  { %v4794_v60 = vpop.f32.mrf.mxu1  ;;  %v4796_v0 = vpop.f32.mrf.mxu0 }
 0x5be   :  { %v1857_v8 = vsel %vm1823_vm3, %v4796_v0, -inf  ;;  %v1854_v19 = vsel %vm1823_vm3, %v4794_v60, -inf }
 0x5bf   :  { %v4012_v3 = vpop.f32.mrf.mxu1  ;;  %1849 = vmax.xlane.f32.xlu0 %v1848_v2  ;;  %1858 = vmax.xlane.f32.xlu1 %v1857_v8  ;;  %v4017_v10 = vpop.f32.mrf.mxu0 }
 0x5c1   :  { %v4802_v13 = vpop.f32.mrf.mxu1  ;;  %v4804_v14 = vpop.f32.mrf.mxu0 }
 0x5c2   :  { %v1863_v21 = vsel %vm1823_vm3, %v4804_v14, -inf  ;;  %v1860_v33 = vsel %vm1823_vm3, %v4802_v13, -inf }
 0x5c3   :  { %v4022_v20 = vpop.f32.mrf.mxu1  ;;  %1855 = vmax.xlane.f32.xlu0 %v1854_v19  ;;  %1864 = vmax.xlane.f32.xlu1 %v1863_v21  ;;  %v4027_v28 = vpop.f32.mrf.mxu0 }
 0x5c5   :  { %v4810_v22 = vpop.f32.mrf.mxu1  ;;  %v4812_v29 = vpop.f32.mrf.mxu0 }
 0x5c6   :  { %v1869_v36 = vsel %vm1823_vm3, %v4812_v29, -inf  ;;  %v1866_v38 = vsel %vm1823_vm3, %v4810_v22, -inf }
 0x5c7   :  { %v4032_v34 = vpop.f32.mrf.mxu1  ;;  %1861 = vmax.xlane.f32.xlu0 %v1860_v33  ;;  %1870 = vmax.xlane.f32.xlu1 %v1869_v36  ;;  %v4037_v35 = vpop.f32.mrf.mxu0 }
 0x5cb   :  { %1867 = vmax.xlane.f32.xlu0 %v1866_v38 }
 0x634   :  { %v1826_v39 = vpop.xlane.xlu0 %1825  ;;  %v1829_v43 = vpop.xlane.xlu1 %1828 }
 0x635   :  { %v1872_v40 = vsub.f32 %v4756_v31, %v1826_v39  ;;  %v1873_v44 = vsub.f32 %v4758_v32, %v1829_v43 }
 0x637   :  { %v1888_v45 = vmul.f32 1.442695, %v1872_v40  ;;  %v1890_v46 = vmul.f32 1.442695, %v1873_v44 }
 0x638   :  { %v1832_v50 = vpop.xlane.xlu0 %1831 }
 0x639   :  { %4202 = vpow2.f32 %v1888_v45  ;;  %v1874_v51 = vsub.f32 %v4764_v37, %v1832_v50 }
 0x63a   :  { %4204 = vpow2.f32 %v1890_v46 }
 0x63b   :  { %v1892_v52 = vmul.f32 1.442695, %v1874_v51 }
 0x63c   :  { %v1835_v53 = vpop.xlane.xlu0 %1834  ;;  %v1841_v57 = vpop.xlane.xlu1 %1840 }
 0x63d   :  { %4206 = vpow2.f32 %v1892_v52  ;;  %v1875_v56 = vsub.f32 %v4766_v17, %v1835_v53  ;;  %v1877_v58 = vsub.f32 %v4772_v42, %v1841_v57 }
 0x63f   :  { %v1894_v59 = vmul.f32 1.442695, %v1875_v56  ;;  %v1898_v31 = vmul.f32 1.442695, %v1877_v58 }
 0x640   :  { %v1838_v2 = vpop.xlane.xlu0 %1837  ;;  %v1847_v3 = vpop.xlane.xlu1 %1846 }
 0x641   :  { %4208 = vpow2.f32 %v1894_v59  ;;  %v1876_v32 = vsub.f32 %v4770_v41, %v1838_v2  ;;  %v1879_v8 = vsub.f32 %v4780_v49, %v1847_v3 }
 0x642   :  { %4210 = vpow2.f32 %v1898_v31 }
 0x643   :  { %v1896_v37 = vmul.f32 1.442695, %v1876_v32  ;;  %v1902_v10 = vmul.f32 1.442695, %v1879_v8 }
 0x644   :  { %v1844_v19 = vpop.xlane.xlu0 %1843  ;;  %v1853_v17 = vpop.xlane.xlu1 %1852 }
 0x645   :  { %4212 = vpow2.f32 %v1896_v37  ;;  %v1878_v20 = vsub.f32 %v4778_v48, %v1844_v19  ;;  %v1881_v42 = vsub.f32 %v4788_v55, %v1853_v17 }
 0x646   :  { %v4828_v21 = vpop.eup %4202  ;;  %4214 = vpow2.f32 %v1902_v10 }
 0x647   :  { %v4831_v28 = vpop.eup %4204  ;;  %v1900_v33 = vmul.f32 1.442695, %v1878_v20  ;;  %v1920_v41 = vsel %vm1823_vm3, %v4828_v21, 0.0  ;;  %v1906_v49 = vmul.f32 1.442695, %v1881_v42 }
 0x648   :  { %1921 = vadd.xlane.f32.xlu0 %v1920_v41  ;;  %v1850_v34 = vpop.xlane.xlu0 %1849  ;;  %v1923_v36 = vsel %vm1823_vm3, %v4831_v28, 0.0  ;;  %v1859_v35 = vpop.xlane.xlu1 %1858 }
 0x649   :  { %4216 = vpow2.f32 %v1900_v33  ;;  %v1880_v48 = vsub.f32 %v4786_v54, %v1850_v34  ;;  %1924 = vadd.xlane.f32.xlu1 %v1923_v36  ;;  %v1883_v55 = vsub.f32 %v4796_v0, %v1859_v35 }
 0x64a   :  { %v4838_v38 = vpop.eup %4206  ;;  %4218 = vpow2.f32 %v1906_v49 }
 0x64b   :  { %v1904_v39 = vmul.f32 1.442695, %v1880_v48  ;;  %v1926_v40 = vsel %vm1823_vm3, %v4838_v38, 0.0  ;;  %v1910_v43 = vmul.f32 1.442695, %v1883_v55 }
 0x64c   :  { %1927 = vadd.xlane.f32.xlu0 %v1926_v40  ;;  %v1856_v44 = vpop.xlane.xlu0 %1855  ;;  %v1865_v46 = vpop.xlane.xlu1 %1864 }
 0x64d   :  { %4220 = vpow2.f32 %v1904_v39  ;;  %v1882_v45 = vsub.f32 %v4794_v60, %v1856_v44  ;;  %v1885_v54 = vsub.f32 %v4804_v14, %v1865_v46 }
 0x64e   :  { %v4844_v50 = vpop.eup %4208  ;;  %4222 = vpow2.f32 %v1910_v43 }
 0x64f   :  { %v1908_v51 = vmul.f32 1.442695, %v1882_v45  ;;  %v1929_v0 = vsel %vm1823_vm3, %v4844_v50, 0.0  ;;  %v4849_v52 = vpop.eup %4210  ;;  %v1914_v53 = vmul.f32 1.442695, %v1885_v54 }
 0x650   :  { %v1862_v56 = vpop.xlane.xlu0 %1861  ;;  %1930 = vadd.xlane.f32.xlu1 %v1929_v0  ;;  %v1871_v58 = vpop.xlane.xlu1 %1870  ;;  %v1935_v2 = vsel %vm1823_vm3, %v4849_v52, 0.0 }
 0x651   :  { %4224 = vpow2.f32 %v1908_v51  ;;  %v1884_v57 = vsub.f32 %v4802_v13, %v1862_v56  ;;  %v1887_v59 = vsub.f32 %v4812_v29, %v1871_v58 }
 0x652   :  { %v4852_v60 = vpop.eup %4212  ;;  %4226 = vpow2.f32 %v1914_v53 }
 0x653   :  { %v1912_v14 = vmul.f32 1.442695, %v1884_v57  ;;  %v1932_v31 = vsel %vm1823_vm3, %v4852_v60, 0.0  ;;  %v4859_v32 = vpop.eup %4214  ;;  %v1918_v3 = vmul.f32 1.442695, %v1887_v59 }
 0x654   :  { %1933 = vadd.xlane.f32.xlu0 %v1932_v31  ;;  %v1868_v8 = vpop.xlane.xlu0 %1867  ;;  %1936 = vadd.xlane.f32.xlu1 %v1935_v2  ;;  %v1941_v19 = vsel %vm1823_vm3, %v4859_v32, 0.0  ;;  %v603_v2 = vmul.f32 %v4554_v1, %v4722_v26 }
 0x655   :  { %4228 = vpow2.f32 %v1912_v14  ;;  %v1886_v13 = vsub.f32 %v4810_v22, %v1868_v8 }
 0x656   :  { %v4862_v37 = vpop.eup %4216  ;;  %4230 = vpow2.f32 %v1918_v3  ;;  %v604_v3 = vmul.f32 %v4564_v7, %v4722_v26 }
 0x657   :  { %v1916_v29 = vmul.f32 1.442695, %v1886_v13  ;;  %v1938_v10 = vsel %vm1823_vm3, %v4862_v37, 0.0  ;;  %v4868_v20 = vpop.eup %4218 }
 0x658   :  { %1939 = vadd.xlane.f32.xlu0 %v1938_v10  ;;  %1942 = vadd.xlane.f32.xlu1 %v1941_v19  ;;  %v1947_v42 = vsel %vm1823_vm3, %v4868_v20, 0.0 }
 0x659   :  { %4232 = vpow2.f32 %v1916_v29  ;;  %v605_v29 = vmul.f32 %v4549_v63, %v4722_v26 }
 0x65a   :  { %v4870_v17 = vpop.eup %4220 }
 0x65b   :  { %v1944_v22 = vsel %vm1823_vm3, %v4870_v17, 0.0  ;;  %v4876_v33 = vpop.eup %4222 }
 0x65c   :  { %1945 = vadd.xlane.f32.xlu0 %v1944_v22  ;;  %1948 = vadd.xlane.f32.xlu1 %v1947_v42  ;;  %v1953_v34 = vsel %vm1823_vm3, %v4876_v33, 0.0  ;;  %v606_v42 = vmul.f32 %v4571_v9, %v4722_v26 }
 0x65e   :  { %v4878_v41 = vpop.eup %4224 }
 0x65f   :  { %v1950_v49 = vsel %vm1823_vm3, %v4878_v41, 0.0  ;;  %v4884_v36 = vpop.eup %4226 }
 0x660   :  { %1951 = vadd.xlane.f32.xlu0 %v1950_v49  ;;  %1954 = vadd.xlane.f32.xlu1 %v1953_v34  ;;  %v1959_v55 = vsel %vm1823_vm3, %v4884_v36, 0.0 }
 0x662   :  { %v4886_v48 = vpop.eup %4228 }
 0x663   :  { %v1956_v35 = vsel %vm1823_vm3, %v4886_v48, 0.0  ;;  %v4892_v39 = vpop.eup %4230 }
 0x664   :  { %1957 = vadd.xlane.f32.xlu0 %v1956_v35  ;;  %1960 = vadd.xlane.f32.xlu1 %v1959_v55  ;;  %v1965_v44 = vsel %vm1823_vm3, %v4892_v39, 0.0  ;;  %v4931_v35 = vadd.f32 %v4754_v30, %v4706_v18 }
 0x666   :  { %v4894_v40 = vpop.eup %4232 }
 0x667   :  { %v1962_v43 = vsel %vm1823_vm3, %v4894_v40, 0.0 }
 0x668   :  { %1963 = vadd.xlane.f32.xlu0 %v1962_v43  ;;  %1966 = vadd.xlane.f32.xlu1 %v1965_v44 }
 0x6d1   :  { %v1922_v45 = vpop.xlane.xlu0 %1921 }
 0x6d2   :  { %4234 = vrcp.f32 %v1922_v45  ;;  %v1925_v46 = vpop.xlane.xlu1 %1924  ;;  %v607_v45 = vmul.f32 %v4559_v6, %v4722_v26 }
 0x6d3   :  { %4236 = vrcp.f32 %v1925_v46  ;;  %v608_v46 = vmul.f32 %v4576_v11, %v4722_v26 }
 0x6d5   :  { %v1928_v54 = vpop.xlane.xlu0 %1927 }
 0x6d6   :  { %4238 = vrcp.f32 %v1928_v54 }
 0x6d9   :  { %v1931_v51 = vpop.xlane.xlu1 %1930 }
 0x6da   :  { %4240 = vrcp.f32 %v1931_v51  ;;  %v609_v51 = vmul.f32 %v4541_v61, %v4931_v35 }
 0x6dd   :  { %v1934_v0 = vpop.xlane.xlu0 %1933  ;;  %v1937_v53 = vpop.xlane.xlu1 %1936 }
 0x6de   :  { %4242 = vrcp.f32 %v1934_v0 }
 0x6df   :  { %v4235_v56 = vpop.eup %4234  ;;  %4244 = vrcp.f32 %v1937_v53 }
 0x6e0   :  { %v4237_v57 = vpop.eup %4236  ;;  %v1984_v58 = vmul.f32 %v4235_v56, %v4828_v21  ;;  %v612_v56 = vmul.f32 %v4564_v7, %v4931_v35  ;;  %v613_v7 = vmul.f32 %v4549_v63, %v4931_v35 }
 0x6e1   :  { %v1940_v59 = vpop.xlane.xlu0 %1939  ;;  %v1943_v14 = vpop.xlane.xlu1 %1942  ;;  %v1985_v31 = vmul.f32 %v4237_v57, %v4831_v28 }
 0x6e2   :  { %4246 = vrcp.f32 %v1940_v59  ;;  %4041 = vmatmul.mubr.msk.f32.vlgmr.msra.gmra.mxu1 %vm1823_vm3, %v1984_v58  ;;  %v614_v58 = vmul.f32 %v4571_v9, %v4931_v35  ;;  %v615_v9 = vmul.f32 %v4559_v6, %v4931_v35 }
 0x6e3   :  { %v4239_v8 = vpop.eup %4238  ;;  %4248 = vrcp.f32 %v1943_v14  ;;  %4046 = vmatmul.mubr.msk.f32.vlgmr.msra.gmra.mxu0 %vm1823_vm3, %v1985_v31  ;;  %4049 = vmatpush3.msra.mxu1 %v603_v2  ;;  %v616_v14 = vmul.f32 %v4576_v11, %v4931_v35  ;;  %v3205_v11 = vld [vmem:[%s5162_s1 + $0xd8] sm:$0xff]  ;;  %v3204_v2 = vld [vmem:[%s5162_s1 + $0xd0] sm:$0xff] }
 0x6e4   :  { %4054 = vmatpush3.msra.mxu0 %v604_v3  ;;  %4050 = vmatprep.mubr.msk.f32.mxu1 %vm4312_vm2, %v4309_v47  ;;  %v1986_v21 = vmul.f32 %v4239_v8, %v4838_v38  ;;  %v3200_v3 = vld [vmem:[%s5162_s1 + $0xb0] sm:$0xff]  ;;  %v3199_v8 = vld [vmem:[%s5162_s1 + $0xa8] sm:$0xff] }
 0x6e5   :  { %4058 = vmatprep.subr.mxu1 %v4309_v47  ;;  %v1946_v28 = vpop.xlane.xlu0 %1945  ;;  %v1949_v13 = vpop.xlane.xlu1 %1948  ;;  %4055 = vmatprep.mubr.msk.f32.mxu0 %vm4312_vm2, %v4309_v47 }
 0x6e6   :  { %4250 = vrcp.f32 %v1946_v28  ;;  %4051 = vmatmul.mubr.msk.f32.vlgmr.msra.gmra.mxu1 %vm1823_vm3, %v1986_v21  ;;  %4063 = vmatprep.subr.mxu0 %v4309_v47  ;;  %v3198_v21 = vld [vmem:[%s5162_s1 + $0xa0] sm:$0xff] }
 0x6e7   :  { %v4241_v10 = vpop.eup %4240  ;;  %4252 = vrcp.f32 %v1949_v13  ;;  %4059 = vmatpush3.msra.mxu1 %v605_v29  ;;  %4060 = vmatprep.mubr.msk.f32.mxu1 %vm4312_vm2, %v4309_v47 }
 0x6e8   :  { %v1987_v38 = vmul.f32 %v4241_v10, %v4844_v50  ;;  %4068 = vmatprep.subr.mxu1 %v4309_v47 }
 0x6e9   :  { %v1952_v19 = vpop.xlane.xlu0 %1951  ;;  %v1955_v22 = vpop.xlane.xlu1 %1954 }
 0x6ea   :  { %4254 = vrcp.f32 %v1952_v19  ;;  %4056 = vmatmul.mubr.msk.f32.vlgmr.msra.gmra.mxu0 %vm1823_vm3, %v1987_v38 }
 0x6eb   :  { %v4243_v49 = vpop.eup %4242  ;;  %4256 = vrcp.f32 %v1955_v22  ;;  %4064 = vmatpush3.msra.mxu0 %v606_v42  ;;  %4065 = vmatprep.mubr.msk.f32.mxu0 %vm4312_vm2, %v4309_v47 }
 0x6ec   :  { %v4245_v34 = vpop.eup %4244  ;;  %4073 = vmatprep.subr.mxu0 %v4309_v47  ;;  %v1988_v50 = vmul.f32 %v4243_v49, %v4852_v60 }
 0x6ed   :  { %v1958_v55 = vpop.xlane.xlu0 %1957  ;;  %v1961_v43 = vpop.xlane.xlu1 %1960  ;;  %v1989_v44 = vmul.f32 %v4245_v34, %v4849_v52 }
 0x6ee   :  { %4258 = vrcp.f32 %v1958_v55  ;;  %4061 = vmatmul.mubr.msk.f32.vlgmr.msra.gmra.mxu1 %vm1823_vm3, %v1988_v50 }
 0x6ef   :  { %v4247_v54 = vpop.eup %4246  ;;  %4260 = vrcp.f32 %v1961_v43  ;;  %4066 = vmatmul.mubr.msk.f32.vlgmr.msra.gmra.mxu0 %vm1823_vm3, %v1989_v44  ;;  %4069 = vmatpush3.msra.mxu1 %v607_v45 }
 0x6f0   :  { %v4249_v18 = vpop.eup %4248  ;;  %4074 = vmatpush3.msra.mxu0 %v608_v46  ;;  %4070 = vmatprep.mubr.msk.f32.mxu1 %vm4312_vm2, %v4309_v47  ;;  %v1990_v30 = vmul.f32 %v4247_v54, %v4862_v37  ;;  %v610_v37 = vmul.f32 %v4544_v62, %v4931_v35  ;;  %v611_v62 = vmul.f32 %v4554_v1, %v4931_v35 }
 0x6f1   :  { %4078 = vmatprep.subr.mxu1 %v4309_v47  ;;  %v1964_v52 = vpop.xlane.xlu0 %1963  ;;  %4075 = vmatprep.mubr.msk.f32.mxu0 %vm4312_vm2, %v4309_v47  ;;  %v1967_v60 = vpop.xlane.xlu1 %1966  ;;  %v1991_v26 = vmul.f32 %v4249_v18, %v4859_v32 }
 0x6f2   :  { %4262 = vrcp.f32 %v1964_v52  ;;  %4083 = vmatprep.subr.mxu0 %v4309_v47  ;;  %4071 = vmatmul.mubr.msk.f32.vlgmr.msra.gmra.mxu1 %vm1823_vm3, %v1990_v30 }
 0x6f3   :  { %v4251_v0 = vpop.eup %4250  ;;  %4264 = vrcp.f32 %v1967_v60  ;;  %4076 = vmatmul.mubr.msk.f32.vlgmr.msra.gmra.mxu0 %vm1823_vm3, %v1991_v26  ;;  %4079 = vmatpush3.msra.mxu1 %v609_v51 }
 0x6f4   :  { %v4253_v53 = vpop.eup %4252  ;;  %4084 = vmatpush3.msra.mxu0 %v610_v37  ;;  %4080 = vmatprep.mubr.msk.f32.mxu1 %vm4312_vm2, %v4309_v47  ;;  %v1992_v61 = vmul.f32 %v4251_v0, %v4870_v17 }
 0x6f5   :  { %4085 = vmatprep.mubr.msk.f32.mxu0 %vm4312_vm2, %v4309_v47  ;;  %4088 = vmatprep.subr.mxu1 %v4309_v47  ;;  %v1993_v32 = vmul.f32 %v4253_v53, %v4868_v20 }
 0x6f6   :  { %4093 = vmatprep.subr.mxu0 %v4309_v47  ;;  %4081 = vmatmul.mubr.msk.f32.vlgmr.msra.gmra.mxu1 %vm1823_vm3, %v1992_v61 }
 0x6f7   :  { %v4255_v57 = vpop.eup %4254  ;;  %4086 = vmatmul.mubr.msk.f32.vlgmr.msra.gmra.mxu0 %vm1823_vm3, %v1993_v32  ;;  %4089 = vmatpush3.msra.mxu1 %v611_v62 }
 0x6f8   :  { %v4257_v17 = vpop.eup %4256  ;;  %4094 = vmatpush3.msra.mxu0 %v612_v56  ;;  %4090 = vmatprep.mubr.msk.f32.mxu1 %vm4312_vm2, %v4309_v47  ;;  %v1994_v20 = vmul.f32 %v4255_v57, %v4878_v41 }
 0x6f9   :  { %4095 = vmatprep.mubr.msk.f32.mxu0 %vm4312_vm2, %v4309_v47  ;;  %4098 = vmatprep.subr.mxu1 %v4309_v47  ;;  %v1995_v1 = vmul.f32 %v4257_v17, %v4876_v33 }
 0x6fa   :  { %4103 = vmatprep.subr.mxu0 %v4309_v47  ;;  %4091 = vmatmul.mubr.msk.f32.vlgmr.msra.gmra.mxu1 %vm1823_vm3, %v1994_v20 }
 0x6fb   :  { %v4259_v59 = vpop.eup %4258  ;;  %4096 = vmatmul.mubr.msk.f32.vlgmr.msra.gmra.mxu0 %vm1823_vm3, %v1995_v1  ;;  %4099 = vmatpush3.msra.mxu1 %v613_v7 }
 0x6fc   :  { %v4261_v41 = vpop.eup %4260  ;;  %4104 = vmatpush3.msra.mxu0 %v614_v58  ;;  %4100 = vmatprep.mubr.msk.f32.mxu1 %vm4312_vm2, %v4309_v47  ;;  %v1996_v33 = vmul.f32 %v4259_v59, %v4886_v48 }
 0x6fd   :  { %4105 = vmatprep.mubr.msk.f32.mxu0 %vm4312_vm2, %v4309_v47  ;;  %4108 = vmatprep.subr.mxu1 %v4309_v47  ;;  %v1997_v63 = vmul.f32 %v4261_v41, %v4884_v36 }
 0x6fe   :  { %4113 = vmatprep.subr.mxu0 %v4309_v47  ;;  %4101 = vmatmul.mubr.msk.f32.vlgmr.msra.gmra.mxu1 %vm1823_vm3, %v1996_v33 }
 0x6ff   :  { %v4263_v31 = vpop.eup %4262  ;;  %4106 = vmatmul.mubr.msk.f32.vlgmr.msra.gmra.mxu0 %vm1823_vm3, %v1997_v63  ;;  %4109 = vmatpush3.msra.mxu1 %v615_v9 }
 0x700   :  { %v4265_v48 = vpop.eup %4264  ;;  %4114 = vmatpush3.msra.mxu0 %v616_v14  ;;  %4110 = vmatprep.mubr.msk.f32.mxu1 %vm4312_vm2, %v4309_v47  ;;  %v1998_v36 = vmul.f32 %v4263_v31, %v4894_v40  ;;  %v3201_v40 = vld [vmem:[%s5162_s1 + $0xb8] sm:$0xff] }
 0x701   :  { %4115 = vmatprep.mubr.msk.f32.mxu0 %vm4312_vm2, %v4309_v47  ;;  %v1999_v6 = vmul.f32 %v4265_v48, %v4892_v39  ;;  %4118 = vmatprep.subr.mxu1 %v3205_v11  ;;  %v3203_v47 = vld [vmem:[%s5162_s1 + $0xc8] sm:$0xff]  ;;  %v3202_v39 = vld [vmem:[%s5162_s1 + $0xc0] sm:$0xff] }
 0x702   :  { %4111 = vmatmul.mubr.msk.f32.vlgmr.msra.gmra.mxu1 %vm1823_vm3, %v1998_v36 }
 0x703   :  { %4116 = vmatmul.mubr.msk.f32.vlgmr.msra.gmra.mxu0 %vm1823_vm3, %v1999_v6  ;;  %4119 = vmatpush3.msra.mxu1 %v3205_v11 }
 0x704   :  { %4120 = vmatprep.subr.mxu1 %v3204_v2 }
 0x705   :  { %4121 = vmatpush3.msra.mxu1 %v3204_v2 }
 0x706   :  { %4122 = vmatprep.subr.mxu1 %v3203_v47 }
 0x707   :  { %4123 = vmatpush3.msra.mxu1 %v3203_v47 }
 0x708   :  { %4124 = vmatprep.subr.mxu1 %v3202_v39 }
 0x709   :  { %4125 = vmatpush3.msra.mxu1 %v3202_v39 }
 0x70a   :  { %4126 = vmatprep.subr.mxu1 %v3201_v40 }
 0x70b   :  { %4127 = vmatpush3.msra.mxu1 %v3201_v40 }
 0x70c   :  { %4128 = vmatprep.subr.mxu1 %v3200_v3 }
 0x70d   :  { %4129 = vmatpush3.msra.mxu1 %v3200_v3 }
 0x70e   :  { %4130 = vmatprep.subr.mxu1 %v3199_v8 }
 0x70f   :  { %4131 = vmatpush3.msra.mxu1 %v3199_v8 }
 0x710   :  { %4132 = vmatprep.subr.mxu1 %v3198_v21 }
 0x711   :  { %4133 = vmatpush3.msra.mxu1 %v3198_v21 }
 0x7a2   :  { %v2069_v28 = vpop.f32.mrf.mxu1 }
 0x7a3   :  { %v2142_v13 = vpop.f32.mrf.mxu0  ;;  %v3168_v19 = vsel %vm132_vm1, %v2069_v28, 0.0 }
 0x7a4   :  { %v4042_v29 = vpop.f32.mrf.mxu1  ;;  %v3169_v22 = vsel %vm132_vm1, %v2142_v13, 0.0 }
 0x7a5   :  { %v4047_v10 = vpop.f32.mrf.mxu0  ;;  %v3170_v34 = vadd.f32 %v3169_v22, %v3168_v19 }
 0x7a6   :  { %v2215_v38 = vpop.f32.mrf.mxu1 }
 0x7a7   :  { %v3171_v49 = vsel %vm132_vm1, %v2215_v38, 0.0 }
 0x7a8   :  { %v4052_v42 = vpop.f32.mrf.mxu1  ;;  %v3172_v55 = vadd.f32 %v3171_v49, %v3170_v34  ;;  %v4286_v49 = vld [vmem:[%s5166_s5 + $0x10] sm:$0xff] }
 0x7a9   :  { %v3208_v42 = vsub.s32 6, %v4395_v15 }
 0x7aa   :  { %v2288_v50 = vpop.f32.mrf.mxu0 }
 0x7ab   :  { %v3173_v35 = vsel %vm132_vm1, %v2288_v50, 0.0  ;;  %v3209_v34 = vrot.slane %v4286_v49, %v3208_v42 }
 0x7ac   :  { %v4057_v43 = vpop.f32.mrf.mxu0  ;;  %v3174_v44 = vadd.f32 %v3173_v35, %v3172_v55 }
 0x7ae   :  { %v2361_v45 = vpop.f32.mrf.mxu1 }
 0x7af   :  { %v3175_v46 = vsel %vm132_vm1, %v2361_v45, 0.0  ;;  %v2434_v54 = vpop.f32.mrf.mxu0 }
 0x7b0   :  { %v3176_v18 = vadd.f32 %v3175_v46, %v3174_v44  ;;  %v4062_v30 = vpop.f32.mrf.mxu1  ;;  %v3177_v52 = vsel %vm132_vm1, %v2434_v54, 0.0 }
 0x7b1   :  { %v4067_v60 = vpop.f32.mrf.mxu0 }
 0x7b2   :  { %v3178_v26 = vadd.f32 %v3177_v52, %v3176_v18  ;;  %v2507_v51 = vpop.f32.mrf.mxu1 }
 0x7b3   :  { %v3179_v37 = vsel %vm132_vm1, %v2507_v51, 0.0  ;;  %v2580_v0 = vpop.f32.mrf.mxu0 }
 0x7b4   :  { %v3180_v53 = vadd.f32 %v3179_v37, %v3178_v26  ;;  %v4072_v61 = vpop.f32.mrf.mxu1  ;;  %v3181_v32 = vsel %vm132_vm1, %v2580_v0, 0.0 }
 0x7b5   :  { %v4077_v62 = vpop.f32.mrf.mxu0  ;;  %v3338_v61 = vld [vmem:[%s5165_s4 + $0x30] sm:$0xff] }
 0x7b6   :  { %v3182_v56 = vadd.f32 %v3181_v32, %v3180_v53  ;;  %v2653_v57 = vpop.f32.mrf.mxu1  ;;  %v3337_v32 = vld [vmem:[%s5165_s4 + $0x28] sm:$0xff]  ;;  %v3336_v62 = vld [vmem:[%s5165_s4 + $0x20] sm:$0xff] }
 0x7b7   :  { %v3183_v17 = vsel %vm132_vm1, %v2653_v57, 0.0  ;;  %v2726_v20 = vpop.f32.mrf.mxu0  ;;  %v3334_v57 = vld [vmem:[%s5165_s4 + $0x10] sm:$0xff] }
 0x7b8   :  { %v3184_v1 = vsel %vm132_vm1, %v2726_v20, 0.0  ;;  %v4082_v7 = vpop.f32.mrf.mxu1  ;;  %4134 = vmatprep.mubr.msk.f32.mxu1 %vm132_vm1, %v3182_v56  ;;  %v3335_v56 = vld [vmem:[%s5165_s4 + $0x18] sm:$0xff]  ;;  %v3332_v20 = vld [vmem:[%s5165_s4] sm:$0xff] }
 0x7b9   :  { %v4087_v58 = vpop.f32.mrf.mxu0  ;;  %v3185_v59 = vadd.f32 %v3184_v1, %v3183_v17  ;;  %v3333_v17 = vld [vmem:[%s5165_s4 + $0x8] sm:$0xff]  ;;  %v3428_v1 = vld [vmem:[%s5162_s1 + $0xf8] sm:$0xff] }
 0x7ba   :  { %v2799_v41 = vpop.f32.mrf.mxu1  ;;  %4156 = vmatprep.subr.mxu1 %v3428_v1 }
 0x7bb   :  { %v3186_v33 = vsel %vm132_vm1, %v2799_v41, 0.0  ;;  %v2872_v63 = vpop.f32.mrf.mxu0 }
 0x7bc   :  { %v3187_v9 = vadd.f32 %v3186_v33, %v3185_v59  ;;  %v4092_v14 = vpop.f32.mrf.mxu1  ;;  %v3188_v31 = vsel %vm132_vm1, %v2872_v63, 0.0 }
 0x7bd   :  { %v4097_v48 = vpop.f32.mrf.mxu0 }
 0x7be   :  { %v3189_v36 = vadd.f32 %v3188_v31, %v3187_v9  ;;  %v2945_v6 = vpop.f32.mrf.mxu1  ;;  %v3322_v9 = vsub.s32 7, %v4395_v15  ;;  %v5087_v48 = vld [vmem:[%s5166_s5 + $0x20] sm:$0x3f] }
 0x7bf   :  { %v3190_v11 = vsel %vm132_vm1, %v2945_v6, 0.0  ;;  %v3018_v2 = vpop.f32.mrf.mxu0 }
 0x7c0   :  { %v3191_v47 = vadd.f32 %v3190_v11, %v3189_v36  ;;  %v4102_v39 = vpop.f32.mrf.mxu1  ;;  %v3192_v40 = vsel %vm132_vm1, %v3018_v2, 0.0  ;;  %v3323_v31 = vrot.slane %v4286_v49, %v3322_v9 }
 0x7c1   :  { %v4107_v3 = vpop.f32.mrf.mxu0 }
 0x7c2   :  { %v3193_v8 = vadd.f32 %v3192_v40, %v3191_v47  ;;  %v3091_v21 = vpop.f32.mrf.mxu1  ;;  %v3329_v47 = vrot.slane %v5087_v48, %v4398_v16  ;;  %v3425_v16 = vld [vmem:[%s5162_s1 + $0xe0] sm:$0xff] }
 0x7c3   :  { %v3194_v28 = vsel %vm132_vm1, %v3091_v21, 0.0  ;;  %v3164_v13 = vpop.f32.mrf.mxu0  ;;  %v3426_v21 = vld [vmem:[%s5162_s1 + $0xe8] sm:$0xff] }
 0x7c4   :  { %v3195_v29 = vadd.f32 %v3194_v28, %v3193_v8  ;;  %v4112_v10 = vpop.f32.mrf.mxu1  ;;  %v3196_v38 = vsel %vm132_vm1, %v3164_v13, 0.0  ;;  %v3427_v8 = vld [vmem:[%s5162_s1 + $0xf0] sm:$0xff]  ;;  %v3343_v28 = vrot.slane %v5087_v48, %v130_v23 }
 0x7c5   :  { %v4117_v19 = vpop.f32.mrf.mxu0 }
 0x7c6   :  { %v3197_v22 = vadd.f32 %v3196_v38, %v3195_v29  ;;  %v3432_v19 = vrot.slane %v5087_v48, %v239_v4 }
 0x7c8   :  { %4135 = vmatmul.mubr.msk.f32.vlgmr.msra.gmra.mxu1 %vm132_vm1, %v3197_v22 }
 0x7c9   :  { %4157 = vmatpush3.msra.mxu1 %v3428_v1  ;;  %v3549_v1 = vrot.slane %v5087_v48, %v285_v12 }
 0x7ca   :  { %4158 = vmatprep.subr.mxu1 %v3427_v8 }
 0x7cb   :  { %4159 = vmatpush3.msra.mxu1 %v3427_v8 }
 0x7cc   :  { %4160 = vmatprep.subr.mxu1 %v3426_v21 }
 0x7cd   :  { %4161 = vmatpush3.msra.mxu1 %v3426_v21 }
 0x7ce   :  { %4162 = vmatprep.subr.mxu1 %v3425_v16 }
 0x7cf   :  { %4163 = vmatpush3.msra.mxu1 %v3425_v16 }
 0x888   :  { %v4136_v50 = vpop.f32.mrf.mxu1 }
 0x889   :  { %v3288_v35 = vadd.f32 %v4136_v50, %v3209_v34 }
 0x88a   :  { %v3282_v55 = vpop.f32.mrf.mxu1 }
 0x88b   :  { %v3283_v43 = vadd.f32 %v3282_v55, %v3209_v34  ;;  %v3292_v44 = vadd.f32 %v3288_v35, %v4591_v25 }
 0x88d   :  { %v3296_v45 = vsel %vm132_vm1, %v3292_v44, 0.0  ;;  %v3291_v46 = vadd.f32 %v3283_v43, %v4585_v24  ;;  %v3339_v24 = vld [vmem:[%s5165_s4 + $0x38] sm:$0xff] }
 0x88e   :  { %3297 = vadd.xlane.f32.xlu1 %v3296_v45  ;;  %4137 = vmatprep.subr.mxu0 %v3339_v24 }
 0x88f   :  { %v3293_v54 = vsel %vm132_vm1, %v3291_v46, 0.0  ;;  %4138 = vmatpush3.msra.mxu0 %v3339_v24 }
 0x890   :  { %3294 = vadd.xlane.f32.xlu0 %v3293_v54  ;;  %4139 = vmatprep.subr.mxu0 %v3338_v61 }
 0x891   :  { %4140 = vmatpush3.msra.mxu0 %v3338_v61 }
 0x892   :  { %4141 = vmatprep.subr.mxu0 %v3337_v32 }
 0x893   :  { %4142 = vmatpush3.msra.mxu0 %v3337_v32 }
 0x894   :  { %4143 = vmatprep.subr.mxu0 %v3336_v62 }
 0x895   :  { %4144 = vmatpush3.msra.mxu0 %v3336_v62 }
 0x896   :  { %4145 = vmatprep.subr.mxu0 %v3335_v56 }
 0x897   :  { %4146 = vmatpush3.msra.mxu0 %v3335_v56 }
 0x898   :  { %4147 = vmatprep.subr.mxu0 %v3334_v57 }
 0x899   :  { %4148 = vmatpush3.msra.mxu0 %v3334_v57 }
 0x89a   :  { %4149 = vmatprep.subr.mxu0 %v3333_v17 }
 0x89b   :  { %4150 = vmatpush3.msra.mxu0 %v3333_v17  ;;  %v3543_v17 = vrot.slane %v5087_v48, %v245_v5 }
 0x89c   :  { %4151 = vmatprep.subr.mxu0 %v3332_v20 }
 0x89d   :  { %4152 = vmatpush3.msra.mxu0 %v3332_v20 }
 0x917   :  { %v3298_v18 = vpop.xlane.xlu1 %3297 }
 0x918   :  { %v3301_v30 = vmul.f32 0.015625, %v3298_v18 }
 0x919   :  { %v3295_v52 = vpop.xlane.xlu0 %3294 }
 0x91a   :  { %v3303_v60 = vsub.f32 %v3292_v44, %v3301_v30  ;;  %v3300_v26 = vmul.f32 0.015625, %v3295_v52  ;;  %v3577_v52 = vld [vmem:[%s5165_s4 + $0x78] sm:$0xff] }
 0x91b   :  { %4167 = vmatprep.subr.mxu0 %v3577_v52 }
 0x91c   :  { %v3302_v51 = vsub.f32 %v3291_v46, %v3300_v26  ;;  %v3305_v37 = vmul.f32 %v3303_v60, %v3303_v60  ;;  %v3575_v26 = vld [vmem:[%s5165_s4 + $0x68] sm:$0xff] }
 0x91e   :  { %v3309_v0 = vsel %vm132_vm1, %v3305_v37, 0.0  ;;  %v3304_v53 = vmul.f32 %v3302_v51, %v3302_v51  ;;  %v3573_v37 = vld [vmem:[%s5165_s4 + $0x58] sm:$0xff] }
 0x91f   :  { %3310 = vadd.xlane.f32.xlu1 %v3309_v0  ;;  %v3572_v0 = vld [vmem:[%s5165_s4 + $0x50] sm:$0xff] }
 0x920   :  { %v3306_v25 = vsel %vm132_vm1, %v3304_v53, 0.0  ;;  %v3571_v53 = vld [vmem:[%s5165_s4 + $0x48] sm:$0xff] }
 0x921   :  { %3307 = vadd.xlane.f32.xlu0 %v3306_v25  ;;  %v3570_v25 = vld [vmem:[%s5165_s4 + $0x40] sm:$0xff] }
 0x9a8   :  { %v3311_v7 = vpop.xlane.xlu1 %3310 }
 0x9a9   :  { %v3313_v58 = vmul.f32 0.015625, %v3311_v7 }
 0x9aa   :  { %v3308_v59 = vpop.xlane.xlu0 %3307 }
 0x9ab   :  { %v3315_v41 = vadd.f32 1e-05, %v3313_v58  ;;  %v3312_v33 = vmul.f32 0.015625, %v3308_v59 }
 0x9ad   :  { %4266 = vrsqrt.f32 %v3315_v41  ;;  %v3314_v63 = vadd.f32 1e-05, %v3312_v33 }
 0x9af   :  { %4268 = vrsqrt.f32 %v3314_v63 }
 0x9ba   :  { %v4267_v14 = vpop.eup %4266 }
 0x9bb   :  { %v3319_v36 = vmul.f32 %v4267_v14, %v3303_v60  ;;  %v3576_v60 = vld [vmem:[%s5165_s4 + $0x70] sm:$0xff] }
 0x9bc   :  { %v4269_v6 = vpop.eup %4268 }
 0x9bd   :  { %v3318_v11 = vmul.f32 %v4269_v6, %v3302_v51  ;;  %v3325_v2 = vmul.f32 %v3323_v31, %v3319_v36  ;;  %v3574_v51 = vld [vmem:[%s5165_s4 + $0x60] sm:$0xff]  ;;  %s4313_s4 = smov [#allocation2]  }
 0x9be   :  { %s3684_s20 = sshll.u32 %s4313_s4, 4  ;;  %s3685_s20 = int_to_ptr.vmem [resolvable:$true] %s3684_s20 }
 0x9bf   :  { %v3324_v39 = vmul.f32 %v3323_v31, %v3318_v11  ;;  %v3331_v3 = vadd.f32 %v3329_v47, %v3325_v2  ;;  %s4287_s21 = scalar_lea.vmem %s3685_s20, 256  ;;  %p4292_p1 = scmp.lt.s32.totalorder %s3685_s20, %s3685_s20 }
 0x9c0   :  { %p4288_p0 = scmp.ne.s32.totalorder %s3685_s20, %s4287_s21  ;;  %p4293_p2 = scmp.lt.s32.totalorder %s4287_s21, %s4287_s21 }
 0x9c1   :  { %v3330_v40 = vadd.f32 %v3329_v47, %v3324_v39 }
 0x9c2   :  { %p4294_p3 = por %p4293_p2, %p4292_p1 }
 0x9c3   :  { %4153 = vmatprep.mubr.msk.f32.mxu0 %vm132_vm1, %v3330_v40 }
 0x9c4   :  { %4154 = vmatmul.mubr.msk.f32.vlgmr.msra.gmra.mxu0 %vm132_vm1, %v3331_v3  ;;  %p4295_p4 = pnand %p4294_p3, %p4288_p0 }
 0x9c5   :  { %4168 = vmatpush3.msra.mxu0 %v3577_v52 }
 0x9c6   :  { %4169 = vmatprep.subr.mxu0 %v3576_v60 }
 0x9c7   :  { %4170 = vmatpush3.msra.mxu0 %v3576_v60 }
 0x9c8   :  { %4171 = vmatprep.subr.mxu0 %v3575_v26 }
 0x9c9   :  { %4172 = vmatpush3.msra.mxu0 %v3575_v26 }
 0x9ca   :  { %4173 = vmatprep.subr.mxu0 %v3574_v51 }
 0x9cb   :  { %4174 = vmatpush3.msra.mxu0 %v3574_v51 }
 0x9cc   :  { %4175 = vmatprep.subr.mxu0 %v3573_v37 }
 0x9cd   :  { %4176 = vmatpush3.msra.mxu0 %v3573_v37 }
 0x9ce   :  { %4177 = vmatprep.subr.mxu0 %v3572_v0 }
 0x9cf   :  { %4178 = vmatpush3.msra.mxu0 %v3572_v0 }
 0x9d0   :  { %4179 = vmatprep.subr.mxu0 %v3571_v53 }
 0x9d1   :  { %4180 = vmatpush3.msra.mxu0 %v3571_v53 }
 0x9d2   :  { %4181 = vmatprep.subr.mxu0 %v3570_v25 }
 0x9d3   :  { %4182 = vmatpush3.msra.mxu0 %v3570_v25 }
 0xa84   :  { %v4155_v13 = vpop.f32.mrf.mxu0 }
 0xa85   :  { %v5107_v38 = vadd.f32 %v4155_v13, %v3343_v28 }
 0xa86   :  { %v3416_v29 = vpop.f32.mrf.mxu0 }
 0xa87   :  { %v5105_v10 = vadd.f32 %v3416_v29, %v3343_v28  ;;  %v3581_v29 = vrot.slane %v5087_v48, %v4596_v27 }
 0xa89   :  { %4164 = vmatprep.mubr.msk.f32.mxu1 %vm38_vm0, %v5105_v10 }
 0xa8a   :  { %4165 = vmatmul.mubr.msk.f32.vlgmr.msra.gmra.mxu1 %vm38_vm0, %v5107_v38 }
 0xb4a   :  { %v4166_v22 = vpop.f32.mrf.mxu1 }
 0xb4b   :  { %v3511_v42 = vadd.f32 %v4166_v22, %v3432_v19 }
 0xb4c   :  { %v3505_v49 = vpop.f32.mrf.mxu1 }
 0xb4d   :  { %v3506_v23 = vadd.f32 %v3505_v49, %v3432_v19  ;;  %v3517_v34 = vsel %vm132_vm1, %v3511_v42, 0.0 }
 0xb4e   :  { %3518 = vadd.xlane.f32.xlu1 %v3517_v34 }
 0xb4f   :  { %v3514_v50 = vsel %vm132_vm1, %v3506_v23, 0.0 }
 0xb50   :  { %3515 = vadd.xlane.f32.xlu0 %v3514_v50 }
 0xbd7   :  { %v3519_v35 = vpop.xlane.xlu1 %3518 }
 0xbd8   :  { %v3521_v55 = vmul.f32 0.015625, %v3519_v35 }
 0xbd9   :  { %v3516_v43 = vpop.xlane.xlu0 %3515 }
 0xbda   :  { %v3523_v44 = vsub.f32 %v3511_v42, %v3521_v55  ;;  %v3520_v45 = vmul.f32 0.015625, %v3516_v43 }
 0xbdc   :  { %v3522_v46 = vsub.f32 %v3506_v23, %v3520_v45  ;;  %v3525_v54 = vmul.f32 %v3523_v44, %v3523_v44 }
 0xbde   :  { %v3529_v18 = vsel %vm132_vm1, %v3525_v54, 0.0  ;;  %v3524_v4 = vmul.f32 %v3522_v46, %v3522_v46 }
 0xbdf   :  { %3530 = vadd.xlane.f32.xlu1 %v3529_v18 }
 0xbe0   :  { %v3526_v30 = vsel %vm132_vm1, %v3524_v4, 0.0 }
 0xbe1   :  { %3527 = vadd.xlane.f32.xlu0 %v3526_v30 }
 0xc68   :  { %v3531_v24 = vpop.xlane.xlu1 %3530 }
 0xc69   :  { %v3533_v61 = vmul.f32 0.015625, %v3531_v24 }
 0xc6a   :  { %v3528_v32 = vpop.xlane.xlu0 %3527 }
 0xc6b   :  { %v3535_v62 = vadd.f32 1e-05, %v3533_v61  ;;  %v3532_v56 = vmul.f32 0.015625, %v3528_v32 }
 0xc6d   :  { %4270 = vrsqrt.f32 %v3535_v62  ;;  %v3534_v57 = vadd.f32 1e-05, %v3532_v56 }
 0xc6f   :  { %4272 = vrsqrt.f32 %v3534_v57 }
 0xc7a   :  { %v4271_v20 = vpop.eup %4270 }
 0xc7b   :  { %v3539_v7 = vmul.f32 %v4271_v20, %v3523_v44 }
 0xc7c   :  { %v4273_v58 = vpop.eup %4272 }
 0xc7d   :  { %v3545_v59 = vmul.f32 %v3543_v17, %v3539_v7  ;;  %v3538_v41 = vmul.f32 %v4273_v58, %v3522_v46 }
 0xc7f   :  { %v3551_v33 = vadd.f32 %v3549_v1, %v3545_v59  ;;  %v3544_v63 = vmul.f32 %v3543_v17, %v3538_v41 }
 0xc81   :  { %v3550_v9 = vadd.f32 %v3549_v1, %v3544_v63  ;;  %v3555_v14 = vmul.f32 0.044715, %v3551_v33  ;;  %v3553_v16 = vmul.f32 0.5, %v3551_v33 }
 0xc83   :  { %v3554_v31 = vmul.f32 0.044715, %v3550_v9  ;;  %v3557_v36 = vmul.f32 %v3555_v14, %v3551_v33  ;;  %v3552_v8 = vmul.f32 0.5, %v3550_v9 }
 0xc85   :  { %v3556_v6 = vmul.f32 %v3554_v31, %v3550_v9  ;;  %v3559_v11 = vmul.f32 %v3557_v36, %v3551_v33 }
 0xc87   :  { %v3558_v2 = vmul.f32 %v3556_v6, %v3550_v9  ;;  %v3561_v47 = vadd.f32 %v3559_v11, %v3551_v33 }
 0xc89   :  { %v3560_v5 = vadd.f32 %v3558_v2, %v3550_v9  ;;  %v3563_v39 = vmul.f32 0.7978846, %v3561_v47 }
 0xc8b   :  { %v3562_v40 = vmul.f32 0.7978846, %v3560_v5  ;;  %4274 = vtanh.f32 %v3563_v39 }
 0xc8d   :  { %4276 = vtanh.f32 %v3562_v40 }
 0xc98   :  { %v4275_v15 = vpop.eup %4274 }
 0xc99   :  { %v3567_v3 = vadd.f32 1.0, %v4275_v15 }
 0xc9a   :  { %v4277_v12 = vpop.eup %4276 }
 0xc9b   :  { %v3566_v21 = vadd.f32 1.0, %v4277_v12  ;;  %v3569_v13 = vmul.f32 %v3567_v3, %v3553_v16 }
 0xc9d   :  { %v3568_v28 = vmul.f32 %v3566_v21, %v3552_v8 }
 0xc9f   :  { %4183 = vmatprep.mubr.msk.f32.mxu0 %vm132_vm1, %v3568_v28 }
 0xca0   :  { %4184 = vmatmul.mubr.msk.f32.vlgmr.msra.gmra.mxu0 %vm132_vm1, %v3569_v13 }
 0xd60   :  { %v4185_v19 = vpop.f32.mrf.mxu0 }
 0xd61   :  { %v3660_v22 = vadd.f32 %v4185_v19, %v3581_v29 }
 0xd62   :  { %v3654_v42 = vpop.f32.mrf.mxu0 }
 0xd63   :  { %v3758_v49 = vmul.f32 -1.442695, %v3660_v22  ;;  %v3655_v23 = vadd.f32 %v3654_v42, %v3581_v29 }
 0xd65   :  { %4278 = vpow2.f32 %v3758_v49  ;;  %v3757_v34 = vmul.f32 -1.442695, %v3655_v23 }
 0xd67   :  { %4280 = vpow2.f32 %v3757_v34 }
 0xd72   :  { %v4279_v50 = vpop.eup %4278 }
 0xd73   :  { %v3670_v35 = vadd.f32 1.0, %v4279_v50 }
 0xd74   :  { %v4281_v55 = vpop.eup %4280 }
 0xd75   :  { %4282 = vrcp.f32 %v3670_v35  ;;  %v3669_v43 = vadd.f32 1.0, %v4281_v55 }
 0xd77   :  { %4284 = vrcp.f32 %v3669_v43 }
 0xd82   :  { %v4283_v44 = vpop.eup %4282 }
 0xd83   :  { %v3676_v45 = vmul.f32 %v4283_v44, %v5107_v38 }
 0xd84   :  { %v4285_v27 = vpop.eup %4284 }
 0xd85   :  { %v3675_v48 = vmul.f32 %v4285_v27, %v5105_v10  ;;  %3678 = vst.msk [vmem:[#allocation2 + $0x8] sm:$0xff] %vm38_vm0, %v3676_v45 }
 0xd87   :  { %3677 = vst.msk [vmem:[#allocation2] sm:$0xff] %vm38_vm0, %v3675_v48 }
 0xd88   :  { %4298 = shalt.err (!%p4295_p4)
}
 0xd89   :  { %s4314_s22 = smov 128   ;;  %s4315_s23 = smov 8  }
 0xd8a   :  { %3690 = dma.vmem_to_hbm [thread:$0]  %s3685_s20, 256, %s5167_s6, [#allocation3], %s4314_s22, %s4314_s22, %s4315_s23  }
 0xd8b   :  { %4307 = dma.done.wait [#allocation3], 256  }
 0xd8c   :  { %4308 = vsyncadd [#allocation3], 4294967040 }
 0xd8d   :  { %3694 = vsyncpa [#allocation3], 1 }

</bundles_post_ra>
